<compile_context>
chip_gen: v6e
topology: v6e:2x2x1
jax: 0.10.0
libtpu: 0.0.40
codegen_flags: <defaults>
</compile_context>

<pallas_src>
import numpy as np
import jax
import jax.numpy as jnp
from jax.experimental import pallas as pl
from jax.experimental.pallas import tpu as pltpu


def _round_up(x, m):
    return ((x + m - 1) // m) * m


def _discriminator_kernel(x_ref, w1_ref, b1_ref, w2_ref, b2_ref,
                          w3t_ref, b3_ref, o_ref):
    # Activations kept in f32; matmul operands cast to bf16, accumulate in f32.
    x = x_ref[...].astype(jnp.bfloat16)                              # (TB, D)

    # block1: Linear(D, 512) + LeakyReLU(0.2)  -- MXU
    h = jnp.dot(x, w1_ref[...], preferred_element_type=jnp.float32)
    h = h + b1_ref[...]                                              # (TB, 512)
    h = jnp.where(h > 0, h, 0.2 * h)

    # block2: Linear(512, 256) + LeakyReLU(0.2)  -- MXU
    h = jnp.dot(h.astype(jnp.bfloat16), w2_ref[...],
                preferred_element_type=jnp.float32)
    h = h + b2_ref[...]                                              # (TB, 256)
    h = jnp.where(h > 0, h, 0.2 * h)

    # block3: Linear(256, 1) + Sigmoid  -- VPU/XLU reduction, EUP epilogue.
    logits = jnp.sum(h * w3t_ref[...], axis=-1, keepdims=True)       # (TB, 1)
    logits = logits + b3_ref[...]
    e = jnp.exp(-logits)                                             # EUP
    o_ref[...] = pl.reciprocal(1.0 + e, approx=True).astype(o_ref.dtype)


def discriminator_forward(image, params, *, batch_tile=512):
    """image: (B, C, H, W) float32; params: dict (w1/w2 bf16, rest f32)."""
    b = image.shape[0]
    x = image.reshape(b, -1)                 # matches torch .view(B, -1) (NCHW)
    d = x.shape[1]

    # Pad batch to a sublane-friendly tile size.
    if b <= batch_tile:
        tb = _round_up(max(b, 1), 8)
    else:
        tb = batch_tile
    b_pad = _round_up(b, tb)
    if b_pad != b:
        x = jnp.pad(x, ((0, b_pad - b), (0, 0)))
    grid = (pl.cdiv(b_pad, tb),)

    w1, b1 = params["w1"], params["b1"]
    w2, b2 = params["w2"], params["b2"]
    w3t, b3 = params["w3t"], params["b3"]

    def _pinned(shape):
        # Weights / biases: same block for every grid step -> loaded once,
        # resident in VMEM across the whole batch loop.
        return pl.BlockSpec(shape, lambda i: (0, 0))

    in_specs = [
        pl.BlockSpec((tb, d), lambda i: (i, 0)),     # x tile (double-buffered)
        _pinned((d, 512)),                           # w1 (bf16)
        _pinned((1, 512)),                           # b1
        _pinned((512, 256)),                         # w2 (bf16)
        _pinned((1, 256)),                           # b2
        _pinned((1, 256)),                           # w3^T (f32)
        _pinned((1, 1)),                             # b3
    ]
    out_specs = pl.BlockSpec((tb, 1), lambda i: (i, 0))

    flops = 2 * b_pad * (d * 512 + 512 * 256 + 256)
    bytes_accessed = (
        (d * 512 + 512 * 256) * 2            # bf16 weights
        + (512 + 256 + 256 + 1) * 4          # f32 biases + w3
        + b_pad * d * 4                      # input activations
        + b_pad * 4                          # output
    )
    cost = pl.CostEstimate(flops=flops, transcendentals=2 * b_pad,
                           bytes_accessed=bytes_accessed)

    out = pl.pallas_call(
        _discriminator_kernel,
        out_shape=jax.ShapeDtypeStruct((b_pad, 1), jnp.float32),
        grid=grid,
        in_specs=in_specs,
        out_specs=out_specs,
        compiler_params=pltpu.CompilerParams(
            dimension_semantics=("parallel",)),
        cost_estimate=cost,
    )(x, w1, b1, w2, b2, w3t, b3)

    return out[:b]


def init_params(key, in_features):
    """Deterministic init mimicking PyTorch's default Linear init
    (uniform in +/- 1/sqrt(fan_in)); weights stored as (in, out).
    w1/w2 are stored in bfloat16 (MXU operands), w3 as a (1, 256) f32 row."""
    def linear(k, fan_in, fan_out):
        kw, kb = jax.random.split(k)
        bound = 1.0 / np.sqrt(fan_in)
        w = jax.random.uniform(kw, (fan_in, fan_out), jnp.float32, -bound, bound)
        b = jax.random.uniform(kb, (1, fan_out), jnp.float32, -bound, bound)
        return w, b

    k1, k2, k3 = jax.random.split(key, 3)
    w1, b1 = linear(k1, in_features, 512)
    w2, b2 = linear(k2, 512, 256)
    w3, b3 = linear(k3, 256, 1)
    return {
        "w1": w1.astype(jnp.bfloat16), "b1": b1,
        "w2": w2.astype(jnp.bfloat16), "b2": b2,
        "w3t": w3.reshape(1, 256),                    # f32, used on VPU
        "b3": b3.reshape(1, 1),
    }


def reference_forward(image, params):
    """Pure-JAX (f32) reference using the same (bf16-stored) weight values."""
    x = image.reshape(image.shape[0], -1)
    h = x @ params["w1"].astype(jnp.float32) + params["b1"]
    h = jnp.where(h > 0, h, 0.2 * h)
    h = h @ params["w2"].astype(jnp.float32) + params["b2"]
    h = jnp.where(h > 0, h, 0.2 * h)
    logits = jnp.sum(h * params["w3t"], axis=-1, keepdims=True) + params["b3"]
    return jax.nn.sigmoid(logits)


if __name__ == "__main__":
    image_shape = (4, 16, 16)          # (C, H, W) -> 1024 input features
    batch = 2

    key = jax.random.PRNGKey(0)
    k_img, k_params = jax.random.split(key)

    image = jax.random.normal(k_img, (batch, *image_shape), jnp.float32)
    params = init_params(k_params, int(np.prod(image_shape)))

    out = discriminator_forward(image, params)
    out = jax.block_until_ready(out)

    ref = reference_forward(image, params)
    # bf16 matmul operands + approx reciprocal -> ~1e-2 agreement vs f32 ref.
    np.testing.assert_allclose(np.asarray(out), np.asarray(ref),
                               rtol=2e-2, atol=2e-2)
    assert out.shape == (batch, 1)

    print("KERNEL_OK")
</pallas_src>

<mosaic_0001>
module attributes {stable_mosaic.version = 11 : i64} {
  func.func @_discriminator_kernel(%arg0: i32, %arg1: memref<8x1024xf32, #tpu.memory_space<vmem>>, %arg2: memref<1024x512xbf16, #tpu.memory_space<vmem>>, %arg3: memref<1x512xf32, #tpu.memory_space<vmem>>, %arg4: memref<512x256xbf16, #tpu.memory_space<vmem>>, %arg5: memref<1x256xf32, #tpu.memory_space<vmem>>, %arg6: memref<1x256xf32, #tpu.memory_space<vmem>>, %arg7: memref<1x1xf32, #tpu.memory_space<vmem>>, %arg8: memref<8x1xf32, #tpu.memory_space<vmem>>) attributes {dimension_semantics = [#tpu.dimension_semantics<parallel>], iteration_bounds = array<i64: 1>, scalar_prefetch = 0 : i64, scratch_operands = 0 : i64, tpu.core_type = #tpu.core_type<tc>, window_params = [{transform_indices = @transform_0, window_bounds = array<i64: 8, 1024>}, {pipeline_mode = #tpu.pipeline_mode<synchronous>, transform_indices = @transform_1, window_bounds = array<i64: 1024, 512>}, {pipeline_mode = #tpu.pipeline_mode<synchronous>, transform_indices = @transform_2, window_bounds = array<i64: 1, 512>}, {pipeline_mode = #tpu.pipeline_mode<synchronous>, transform_indices = @transform_3, window_bounds = array<i64: 512, 256>}, {pipeline_mode = #tpu.pipeline_mode<synchronous>, transform_indices = @transform_4, window_bounds = array<i64: 1, 256>}, {pipeline_mode = #tpu.pipeline_mode<synchronous>, transform_indices = @transform_5, window_bounds = array<i64: 1, 256>}, {pipeline_mode = #tpu.pipeline_mode<synchronous>, transform_indices = @transform_6, window_bounds = array<i64: 1, 1>}, {transform_indices = @transform_7, window_bounds = array<i64: 8, 1>}]} {
    %c0 = arith.constant 0 : index
    %c0_0 = arith.constant 0 : index
    %0 = vector.load %arg1[%c0, %c0_0] : memref<8x1024xf32, #tpu.memory_space<vmem>>, vector<8x1024xf32>
    %1 = arith.truncf %0 : vector<8x1024xf32> to vector<8x1024xbf16>
    %c0_1 = arith.constant 0 : index
    %c0_2 = arith.constant 0 : index
    %2 = vector.load %arg2[%c0_1, %c0_2] : memref<1024x512xbf16, #tpu.memory_space<vmem>>, vector<1024x512xbf16>
    %cst = arith.constant dense<0.000000e+00> : vector<8x512xf32>
    %3 = tpu.matmul %1, %2, %cst {dimension_numbers = #tpu.dot_dimension_numbers<[1], [0], [0], [1], [0, 0, 1, 1], [], []>} : vector<8x1024xbf16>, vector<1024x512xbf16>, vector<8x512xf32> -> vector<8x512xf32>
    %c0_3 = arith.constant 0 : index
    %c0_4 = arith.constant 0 : index
    %4 = vector.load %arg3[%c0_3, %c0_4] : memref<1x512xf32, #tpu.memory_space<vmem>>, vector<1x512xf32>
    %5 = vector.broadcast %4 : vector<1x512xf32> to vector<8x512xf32>
    %6 = arith.addf %3, %5 : vector<8x512xf32>
    %cst_5 = arith.constant 0.000000e+00 : f32
    %7 = vector.broadcast %cst_5 : f32 to vector<8x512xf32>
    %8 = arith.cmpf ogt, %6, %7 : vector<8x512xf32>
    %cst_6 = arith.constant 2.000000e-01 : f32
    %9 = vector.broadcast %cst_6 : f32 to vector<8x512xf32>
    %10 = arith.mulf %9, %6 : vector<8x512xf32>
    %11 = arith.select %8, %6, %10 : vector<8x512xi1>, vector<8x512xf32>
    %12 = arith.truncf %11 : vector<8x512xf32> to vector<8x512xbf16>
    %c0_7 = arith.constant 0 : index
    %c0_8 = arith.constant 0 : index
    %13 = vector.load %arg4[%c0_7, %c0_8] : memref<512x256xbf16, #tpu.memory_space<vmem>>, vector<512x256xbf16>
    %cst_9 = arith.constant dense<0.000000e+00> : vector<8x256xf32>
    %14 = tpu.matmul %12, %13, %cst_9 {dimension_numbers = #tpu.dot_dimension_numbers<[1], [0], [0], [1], [0, 0, 1, 1], [], []>} : vector<8x512xbf16>, vector<512x256xbf16>, vector<8x256xf32> -> vector<8x256xf32>
    %c0_10 = arith.constant 0 : index
    %c0_11 = arith.constant 0 : index
    %15 = vector.load %arg5[%c0_10, %c0_11] : memref<1x256xf32, #tpu.memory_space<vmem>>, vector<1x256xf32>
    %16 = vector.broadcast %15 : vector<1x256xf32> to vector<8x256xf32>
    %17 = arith.addf %14, %16 : vector<8x256xf32>
    %cst_12 = arith.constant 0.000000e+00 : f32
    %18 = vector.broadcast %cst_12 : f32 to vector<8x256xf32>
    %19 = arith.cmpf ogt, %17, %18 : vector<8x256xf32>
    %cst_13 = arith.constant 2.000000e-01 : f32
    %20 = vector.broadcast %cst_13 : f32 to vector<8x256xf32>
    %21 = arith.mulf %20, %17 : vector<8x256xf32>
    %22 = arith.select %19, %17, %21 : vector<8x256xi1>, vector<8x256xf32>
    %c0_14 = arith.constant 0 : index
    %c0_15 = arith.constant 0 : index
    %23 = vector.load %arg6[%c0_14, %c0_15] : memref<1x256xf32, #tpu.memory_space<vmem>>, vector<1x256xf32>
    %24 = vector.broadcast %23 : vector<1x256xf32> to vector<8x256xf32>
    %25 = arith.mulf %22, %24 : vector<8x256xf32>
    %cst_16 = arith.constant dense<0.000000e+00> : vector<8xf32>
    %26 = vector.multi_reduction <add>, %25, %cst_16 [1] : vector<8x256xf32> to vector<8xf32>
    %27 = vector.shape_cast %26 : vector<8xf32> to vector<8x1xf32>
    %c0_17 = arith.constant 0 : index
    %c0_18 = arith.constant 0 : index
    %28 = vector.load %arg7[%c0_17, %c0_18] : memref<1x1xf32, #tpu.memory_space<vmem>>, vector<1x1xf32>
    %29 = vector.broadcast %28 : vector<1x1xf32> to vector<8x1xf32>
    %30 = arith.addf %27, %29 : vector<8x1xf32>
    %cst_19 = arith.constant 0.000000e+00 : f32
    %31 = vector.broadcast %cst_19 : f32 to vector<8x1xf32>
    %32 = arith.subf %31, %30 : vector<8x1xf32>
    %33 = math.exp %32 : vector<8x1xf32>
    %cst_20 = arith.constant 1.000000e+00 : f32
    %34 = vector.broadcast %cst_20 : f32 to vector<8x1xf32>
    %35 = arith.addf %34, %33 : vector<8x1xf32>
    %36 = tpu.reciprocal %35 {approx = true} : vector<8x1xf32> -> vector<8x1xf32>
    %c0_21 = arith.constant 0 : index
    %c0_22 = arith.constant 0 : index
    %37 = vector.load %arg8[%c0_21, %c0_22] : memref<8x1xf32, #tpu.memory_space<vmem>>, vector<8x1xf32>
    tpu.vector_store %arg8[%c0_21, %c0_22], %36 {strides = array<i32>} : memref<8x1xf32, #tpu.memory_space<vmem>>, vector<8x1xf32>,
    return
  }
  func.func @transform_0(%arg0: i32) -> (i32, i32) {
    %c0_i32 = arith.constant 0 : i32
    %c0_i32_0 = arith.constant 0 : i32
    return %arg0, %c0_i32 : i32, i32
  }
  func.func @transform_1(%arg0: i32) -> (i32, i32) {
    %c0_i32 = arith.constant 0 : i32
    %c0_i32_0 = arith.constant 0 : i32
    %c0_i32_1 = arith.constant 0 : i32
    return %c0_i32, %c0_i32_0 : i32, i32
  }
  func.func @transform_2(%arg0: i32) -> (i32, i32) {
    %c0_i32 = arith.constant 0 : i32
    %c0_i32_0 = arith.constant 0 : i32
    %c0_i32_1 = arith.constant 0 : i32
    return %c0_i32, %c0_i32_0 : i32, i32
  }
  func.func @transform_3(%arg0: i32) -> (i32, i32) {
    %c0_i32 = arith.constant 0 : i32
    %c0_i32_0 = arith.constant 0 : i32
    %c0_i32_1 = arith.constant 0 : i32
    return %c0_i32, %c0_i32_0 : i32, i32
  }
  func.func @transform_4(%arg0: i32) -> (i32, i32) {
    %c0_i32 = arith.constant 0 : i32
    %c0_i32_0 = arith.constant 0 : i32
    %c0_i32_1 = arith.constant 0 : i32
    return %c0_i32, %c0_i32_0 : i32, i32
  }
  func.func @transform_5(%arg0: i32) -> (i32, i32) {
    %c0_i32 = arith.constant 0 : i32
    %c0_i32_0 = arith.constant 0 : i32
    %c0_i32_1 = arith.constant 0 : i32
    return %c0_i32, %c0_i32_0 : i32, i32
  }
  func.func @transform_6(%arg0: i32) -> (i32, i32) {
    %c0_i32 = arith.constant 0 : i32
    %c0_i32_0 = arith.constant 0 : i32
    %c0_i32_1 = arith.constant 0 : i32
    return %c0_i32, %c0_i32_0 : i32, i32
  }
  func.func @transform_7(%arg0: i32) -> (i32, i32) {
    %c0_i32 = arith.constant 0 : i32
    %c0_i32_0 = arith.constant 0 : i32
    return %arg0, %c0_i32 : i32, i32
  }
}

</mosaic_0001>

<bundles_post_ra>
// kernel: tpu_custom_call.1
= control target key start
LH: loop header
LB: loop body
LE: loop exit
PB: predicated region body
PF: predicated region fallthrough
CT: control target
= control target key end

     0   :  { %s3520_s0 = inlined_call_operand.hbm [shape: f32[8,1024], index: 0, kind: input, shape index: {}]   ;;  %s3521_s1 = inlined_call_operand.hbm [shape: bf16[1024,512], index: 1, kind: input, shape index: {}]   ;;  %s3522_s2 = inlined_call_operand.vmem [shape: f32[1,512], index: 2, kind: input, shape index: {}]   ;;  %s3523_s3 = inlined_call_operand.hbm [shape: bf16[512,256], index: 3, kind: input, shape index: {}]   ;;  %s3524_s4 = inlined_call_operand.vmem [shape: f32[1,256], index: 4, kind: input, shape index: {}]   ;;  %s3525_s5 = inlined_call_operand.vmem [shape: f32[1,256], index: 5, kind: input, shape index: {}]   ;;  %s3526_s6 = inlined_call_operand.<no memory space> [shape: f32[1,1], index: 6, kind: input, shape index: {}]   ;;  %s3527_s7 = inlined_call_operand.vmem [shape: f32[8,1], index: 7, kind: output, shape index: {}]  }
   0x1   :  { %v12_v0 = vstv %s3526_s6 }
   0x2   :  { %13 = vst [vmem:[#allocation2] sm:$0x1] %v12_v0 }
   0x3   :  { %14 = vsyncpa [#allocation4], 0 }
   0x4   :  { %15 = vsyncpa [#allocation6], 0  ;;  %s3383_s26 = smov [#allocation5]  }
   0x5   :  { %s31_s27 = sshll.u32 %s3383_s26, 4  ;;  %s32_s27 = int_to_ptr.vmem [resolvable:$true] %s31_s27 }
   0x6   :  { %s3327_s28 = scalar_lea.vmem %s32_s27, 32768  ;;  %p3332_p1 = scmp.lt.s32.totalorder %s32_s27, %s32_s27 }
   0x7   :  { %p3328_p0 = scmp.ne.s32.totalorder %s32_s27, %s3327_s28  ;;  %p3333_p2 = scmp.lt.s32.totalorder %s3327_s28, %s3327_s28 }
   0x9   :  { %p3334_p3 = por %p3333_p2, %p3332_p1 }
   0xb   :  { %p3335_p4 = pnand %p3334_p3, %p3328_p0 }
   0xd   :  { %3338 = shalt.err (!%p3335_p4)
}
   0xe   :  { %s3384_s29 = smov 256   ;;  %s3385_s30 = smov 16  }
   0xf   :  { %37 = dma.hbm_to_vmem [thread:$0]  %s3521_s1, 32768, %s32_s27, [#allocation6], %s3384_s29, %s3384_s29, %s3385_s30  }
  0x10   :  { %s3386_s6 = smov [#allocation3]   ;;  %s3387_s11 = smov [#allocation7]  }
  0x11   :  { %s22_s10 = sshll.u32 %s3386_s6, 4  ;;  %s45_s12 = sshll.u32 %s3387_s11, 4  ;;  %s23_s10 = int_to_ptr.vmem [resolvable:$true] %s22_s10  ;;  %s46_s12 = int_to_ptr.vmem [resolvable:$true] %s45_s12 }
  0x12   :  { %s3347_s13 = scalar_lea.vmem %s23_s10, 1024  ;;  %p3352_p6 = scmp.lt.s32.totalorder %s23_s10, %s23_s10 }
  0x13   :  { %p3348_p5 = scmp.ne.s32.totalorder %s23_s10, %s3347_s13  ;;  %p3353_p7 = scmp.lt.s32.totalorder %s3347_s13, %s3347_s13 }
  0x15   :  { %p3354_p8 = por %p3353_p7, %p3352_p6 }
  0x17   :  { %p3355_p9 = pnand %p3354_p8, %p3348_p5 }
  0x19   :  { %3358 = shalt.err (!%p3355_p9)
}
  0x1a   :  { %25 = dma.hbm_to_vmem [thread:$0]  %s3520_s0, 1024, %s23_s10, [#allocation4]  }
  0x1b   :  { %s3367_s16 = scalar_lea.vmem %s46_s12, 8192  ;;  %p3372_p11 = scmp.lt.s32.totalorder %s46_s12, %s46_s12 }
  0x1c   :  { %p3368_p10 = scmp.ne.s32.totalorder %s46_s12, %s3367_s16  ;;  %p3373_p12 = scmp.lt.s32.totalorder %s3367_s16, %s3367_s16 }
  0x1e   :  { %p3374_p13 = por %p3373_p12, %p3372_p11 }
  0x20   :  { %p3375_p0 = pnand %p3374_p13, %p3368_p10 }
  0x22   :  { %3378 = shalt.err (!%p3375_p0)
}
  0x23   :  { %s3388_s1 = smov 128   ;;  %s3389_s17 = smov 8  }
  0x24   :  { %51 = dma.hbm_to_vmem [thread:$0]  %s3523_s3, 8192, %s46_s12, [#allocation6], %s3388_s1, %s3388_s1, %s3389_s17  }
  0x25   :  { %3379 = dma.done.wait [#allocation4], 1024  }
  0x26   :  { %3380 = vsyncadd [#allocation4], 4294966272 }
  0x27   :  { %3381 = dma.done.wait [#allocation6], 40960  }
  0x28   :  { %3382 = vsyncadd [#allocation6], 4294926336  ;;  %v2835_v1 = vld [vmem:[#allocation5 + $0xe4] ss:$16 sps:$4 sm:$0xff]   ;;  %v2839_v3 = vld [vmem:[#allocation5 + $0xe0] ss:$16 sps:$4 sm:$0xff]  }
  0x29   :  { %v2837_v2 = vld [vmem:[#allocation5 + $0x2e4] ss:$16 sps:$4 sm:$0xff]   ;;  %1641 = vmatprep.subr.bf16.mxu0 %v2835_v1  ;;  %v2840_v4 = vld [vmem:[#allocation5 + $0x2e0] ss:$16 sps:$4 sm:$0xff]   ;;  %v68_v47 = vld [vmem:[#allocation3 + $0x8] sm:$0xff]  ;;  %vm2499_vm6 = vcmask 7168  }
  0x2a   :  { %1682 = vmatprep.subr.bf16.mxu1 %v2837_v2  ;;  %v2841_v5 = vld [vmem:[#allocation5 + $0xc4] ss:$16 sps:$4 sm:$0xff]   ;;  %1642 = vmatpush1.bf16.msra.mxu0 %v2839_v3  ;;  %v2845_v7 = vld [vmem:[#allocation5 + $0xc0] ss:$16 sps:$4 sm:$0xff]   ;;  %v3442_v50 = vpack.c.bf16 %v68_v47, %v68_v47  ;;  %v70_v51 = vld [vmem:[#allocation3 + $0x18] sm:$0xff] }
  0x2b   :  { %1683 = vmatpush1.bf16.msra.mxu1 %v2840_v4  ;;  %v2843_v6 = vld [vmem:[#allocation5 + $0x2c4] ss:$16 sps:$4 sm:$0xff]   ;;  %1643 = vmatprep.subr.bf16.mxu0 %v2841_v5  ;;  %v2846_v8 = vld [vmem:[#allocation5 + $0x2c0] ss:$16 sps:$4 sm:$0xff]   ;;  %v3444_v53 = vpack.c.bf16 %v70_v51, %v70_v51 }
  0x2c   :  { %1684 = vmatprep.subr.bf16.mxu1 %v2843_v6  ;;  %v2847_v9 = vld [vmem:[#allocation5 + $0xa4] ss:$16 sps:$4 sm:$0xff]   ;;  %v2851_v11 = vld [vmem:[#allocation5 + $0xa0] ss:$16 sps:$4 sm:$0xff]   ;;  %1673 = vmatprep.mubr.bf16.mxu0 %v3442_v50 }
  0x2d   :  { %v2849_v10 = vld [vmem:[#allocation5 + $0x2a4] ss:$16 sps:$4 sm:$0xff]   ;;  %v2852_v12 = vld [vmem:[#allocation5 + $0x2a0] ss:$16 sps:$4 sm:$0xff]   ;;  %1714 = vmatprep.mubr.bf16.mxu1 %v3444_v53 }
  0x2e   :  { %1644 = vmatpush1.bf16.msra.mxu0 %v2845_v7  ;;  %v2853_v13 = vld [vmem:[#allocation5 + $0x84] ss:$16 sps:$4 sm:$0xff]   ;;  %v2857_v15 = vld [vmem:[#allocation5 + $0x80] ss:$16 sps:$4 sm:$0xff]  }
  0x2f   :  { %1685 = vmatpush1.bf16.msra.mxu1 %v2846_v8  ;;  %1645 = vmatprep.subr.bf16.mxu0 %v2847_v9  ;;  %v2855_v14 = vld [vmem:[#allocation5 + $0x284] ss:$16 sps:$4 sm:$0xff]   ;;  %v2858_v16 = vld [vmem:[#allocation5 + $0x280] ss:$16 sps:$4 sm:$0xff]  }
  0x30   :  { %1686 = vmatprep.subr.bf16.mxu1 %v2849_v10  ;;  %v2859_v17 = vld [vmem:[#allocation5 + $0x64] ss:$16 sps:$4 sm:$0xff]   ;;  %v2863_v19 = vld [vmem:[#allocation5 + $0x60] ss:$16 sps:$4 sm:$0xff]  }
  0x31   :  { %v2861_v18 = vld [vmem:[#allocation5 + $0x264] ss:$16 sps:$4 sm:$0xff]   ;;  %v2864_v20 = vld [vmem:[#allocation5 + $0x260] ss:$16 sps:$4 sm:$0xff]  }
  0x32   :  { %1646 = vmatpush1.bf16.msra.mxu0 %v2851_v11  ;;  %v2865_v21 = vld [vmem:[#allocation5 + $0x44] ss:$16 sps:$4 sm:$0xff]   ;;  %v2869_v23 = vld [vmem:[#allocation5 + $0x40] ss:$16 sps:$4 sm:$0xff]  }
  0x33   :  { %1687 = vmatpush1.bf16.msra.mxu1 %v2852_v12  ;;  %1647 = vmatprep.subr.bf16.mxu0 %v2853_v13  ;;  %v2867_v22 = vld [vmem:[#allocation5 + $0x244] ss:$16 sps:$4 sm:$0xff]   ;;  %v2870_v24 = vld [vmem:[#allocation5 + $0x240] ss:$16 sps:$4 sm:$0xff]  }
  0x34   :  { %1688 = vmatprep.subr.bf16.mxu1 %v2855_v14  ;;  %v2871_v25 = vld [vmem:[#allocation5 + $0x24] ss:$16 sps:$4 sm:$0xff]   ;;  %v2875_v27 = vld [vmem:[#allocation5 + $0x20] ss:$16 sps:$4 sm:$0xff]  }
  0x35   :  { %v2873_v26 = vld [vmem:[#allocation5 + $0x224] ss:$16 sps:$4 sm:$0xff]   ;;  %v2876_v28 = vld [vmem:[#allocation5 + $0x220] ss:$16 sps:$4 sm:$0xff]  }
  0x36   :  { %1648 = vmatpush1.bf16.msra.mxu0 %v2857_v15  ;;  %v2877_v29 = vld [vmem:[#allocation5 + $0x4] ss:$16 sps:$4 sm:$0xff]   ;;  %v2881_v31 = vld [vmem:[#allocation5] ss:$16 sps:$4 sm:$0xff]  }
  0x37   :  { %1689 = vmatpush1.bf16.msra.mxu1 %v2858_v16  ;;  %1649 = vmatprep.subr.bf16.mxu0 %v2859_v17  ;;  %v2879_v30 = vld [vmem:[#allocation5 + $0x204] ss:$16 sps:$4 sm:$0xff]   ;;  %v2882_v32 = vld [vmem:[#allocation5 + $0x200] ss:$16 sps:$4 sm:$0xff]  }
  0x38   :  { %1690 = vmatprep.subr.bf16.mxu1 %v2861_v18  ;;  %v2883_v33 = vld [vmem:[#allocation5 + $0x1e4] ss:$16 sps:$4 sm:$0xff]   ;;  %v2887_v35 = vld [vmem:[#allocation5 + $0x1e0] ss:$16 sps:$4 sm:$0xff]  }
  0x39   :  { %v2885_v34 = vld [vmem:[#allocation5 + $0x3e4] ss:$16 sps:$4 sm:$0xff]   ;;  %v2888_v36 = vld [vmem:[#allocation5 + $0x3e0] ss:$16 sps:$4 sm:$0xff]  }
  0x3a   :  { %1650 = vmatpush1.bf16.msra.mxu0 %v2863_v19  ;;  %v2889_v37 = vld [vmem:[#allocation5 + $0x1c4] ss:$16 sps:$4 sm:$0xff]   ;;  %v2893_v39 = vld [vmem:[#allocation5 + $0x1c0] ss:$16 sps:$4 sm:$0xff]  }
  0x3b   :  { %1691 = vmatpush1.bf16.msra.mxu1 %v2864_v20  ;;  %1651 = vmatprep.subr.bf16.mxu0 %v2865_v21  ;;  %v2891_v38 = vld [vmem:[#allocation5 + $0x3c4] ss:$16 sps:$4 sm:$0xff]   ;;  %v2894_v40 = vld [vmem:[#allocation5 + $0x3c0] ss:$16 sps:$4 sm:$0xff]  }
  0x3c   :  { %1692 = vmatprep.subr.bf16.mxu1 %v2867_v22  ;;  %v2895_v41 = vld [vmem:[#allocation5 + $0x1a4] ss:$16 sps:$4 sm:$0xff]   ;;  %v2899_v43 = vld [vmem:[#allocation5 + $0x1a0] ss:$16 sps:$4 sm:$0xff]  }
  0x3d   :  { %v2897_v42 = vld [vmem:[#allocation5 + $0x3a4] ss:$16 sps:$4 sm:$0xff]   ;;  %v2900_v44 = vld [vmem:[#allocation5 + $0x3a0] ss:$16 sps:$4 sm:$0xff]  }
  0x3e   :  { %1652 = vmatpush1.bf16.msra.mxu0 %v2869_v23  ;;  %v2901_v45 = vld [vmem:[#allocation5 + $0x184] ss:$16 sps:$4 sm:$0xff]   ;;  %v2905_v48 = vld [vmem:[#allocation5 + $0x180] ss:$16 sps:$4 sm:$0xff]  }
  0x3f   :  { %1693 = vmatpush1.bf16.msra.mxu1 %v2870_v24  ;;  %1653 = vmatprep.subr.bf16.mxu0 %v2871_v25  ;;  %v2903_v46 = vld [vmem:[#allocation5 + $0x384] ss:$16 sps:$4 sm:$0xff]   ;;  %v2906_v49 = vld [vmem:[#allocation5 + $0x380] ss:$16 sps:$4 sm:$0xff]  }
  0x40   :  { %1694 = vmatprep.subr.bf16.mxu1 %v2873_v26  ;;  %v2907_v52 = vld [vmem:[#allocation5 + $0x164] ss:$16 sps:$4 sm:$0xff]   ;;  %v2911_v55 = vld [vmem:[#allocation5 + $0x160] ss:$16 sps:$4 sm:$0xff]  }
  0x41   :  { %v2909_v54 = vld [vmem:[#allocation5 + $0x364] ss:$16 sps:$4 sm:$0xff]   ;;  %v2912_v56 = vld [vmem:[#allocation5 + $0x360] ss:$16 sps:$4 sm:$0xff]  }
  0x42   :  { %1654 = vmatpush1.bf16.msra.mxu0 %v2875_v27  ;;  %v2913_v57 = vld [vmem:[#allocation5 + $0x144] ss:$16 sps:$4 sm:$0xff]   ;;  %v2917_v59 = vld [vmem:[#allocation5 + $0x140] ss:$16 sps:$4 sm:$0xff]  }
  0x43   :  { %1695 = vmatpush1.bf16.msra.mxu1 %v2876_v28  ;;  %1655 = vmatprep.subr.bf16.mxu0 %v2877_v29  ;;  %v2915_v58 = vld [vmem:[#allocation5 + $0x344] ss:$16 sps:$4 sm:$0xff]   ;;  %v2918_v60 = vld [vmem:[#allocation5 + $0x340] ss:$16 sps:$4 sm:$0xff]  }
  0x44   :  { %1696 = vmatprep.subr.bf16.mxu1 %v2879_v30  ;;  %v2919_v61 = vld [vmem:[#allocation5 + $0x124] ss:$16 sps:$4 sm:$0xff]   ;;  %v2923_v63 = vld [vmem:[#allocation5 + $0x120] ss:$16 sps:$4 sm:$0xff]  }
  0x45   :  { %v2921_v62 = vld [vmem:[#allocation5 + $0x324] ss:$16 sps:$4 sm:$0xff]   ;;  %v2924_v0 = vld [vmem:[#allocation5 + $0x320] ss:$16 sps:$4 sm:$0xff]  }
  0x46   :  { %1656 = vmatpush1.bf16.msra.mxu0 %v2881_v31  ;;  %v2925_v1 = vld [vmem:[#allocation5 + $0x104] ss:$16 sps:$4 sm:$0xff]   ;;  %v2929_v3 = vld [vmem:[#allocation5 + $0x100] ss:$16 sps:$4 sm:$0xff]  }
  0x47   :  { %1697 = vmatpush1.bf16.msra.mxu1 %v2882_v32  ;;  %1657 = vmatprep.subr.bf16.mxu0 %v2883_v33  ;;  %v2927_v2 = vld [vmem:[#allocation5 + $0x304] ss:$16 sps:$4 sm:$0xff]   ;;  %v2930_v4 = vld [vmem:[#allocation5 + $0x300] ss:$16 sps:$4 sm:$0xff]  }
  0x48   :  { %1698 = vmatprep.subr.bf16.mxu1 %v2885_v34  ;;  %v67_v5 = vld [vmem:[#allocation3] sm:$0xff]  ;;  %v69_v6 = vld [vmem:[#allocation3 + $0x10] sm:$0xff] }
  0x49   :  { %v2933_v7 = vld [vmem:[#allocation5 + $0x4e4] ss:$16 sps:$4 sm:$0xff]   ;;  %v3448_v9 = vpack.c.bf16 %v67_v5, %v67_v5  ;;  %v3450_v10 = vpack.c.bf16 %v69_v6, %v69_v6  ;;  %v2931_v11 = vld [vmem:[#allocation5 + $0x4e0] ss:$16 sps:$4 sm:$0xff]  }
  0x4a   :  { %1658 = vmatpush2.bf16.msra.mxu0 %v2887_v35  ;;  %v2936_v8 = vld [vmem:[#allocation5 + $0x6e4] ss:$16 sps:$4 sm:$0xff]   ;;  %v2934_v12 = vld [vmem:[#allocation5 + $0x6e0] ss:$16 sps:$4 sm:$0xff]   ;;  %v72_v35 = vld [vmem:[#allocation3 + $0x28] sm:$0xff] }
  0x4b   :  { %1699 = vmatpush2.bf16.msra.mxu1 %v2888_v36  ;;  %1659 = vmatprep.subr.bf16.mxu0 %v2889_v37  ;;  %v2939_v13 = vld [vmem:[#allocation5 + $0x4c4] ss:$16 sps:$4 sm:$0xff]   ;;  %v2937_v15 = vld [vmem:[#allocation5 + $0x4c0] ss:$16 sps:$4 sm:$0xff]  }
  0x4c   :  { %1700 = vmatprep.subr.bf16.mxu1 %v2891_v38  ;;  %v2942_v14 = vld [vmem:[#allocation5 + $0x6c4] ss:$16 sps:$4 sm:$0xff]   ;;  %v2940_v16 = vld [vmem:[#allocation5 + $0x6c0] ss:$16 sps:$4 sm:$0xff]   ;;  %v3454_v38 = vpack.c.bf16 %v72_v35, %v72_v35  ;;  %v3045_v35 = vld [vmem:[#allocation5 + $0x88] ss:$16 sps:$4 sm:$0xff]  }
  0x4d   :  { %v2945_v17 = vld [vmem:[#allocation5 + $0x4a4] ss:$16 sps:$4 sm:$0xff]   ;;  %v2943_v19 = vld [vmem:[#allocation5 + $0x4a0] ss:$16 sps:$4 sm:$0xff]  }
  0x4e   :  { %1660 = vmatpush2.bf16.msra.mxu0 %v2893_v39  ;;  %v2948_v18 = vld [vmem:[#allocation5 + $0x6a4] ss:$16 sps:$4 sm:$0xff]   ;;  %v2946_v20 = vld [vmem:[#allocation5 + $0x6a0] ss:$16 sps:$4 sm:$0xff]   ;;  %v74_v39 = vld [vmem:[#allocation3 + $0x38] sm:$0xff] }
  0x4f   :  { %1701 = vmatpush2.bf16.msra.mxu1 %v2894_v40  ;;  %1661 = vmatprep.subr.bf16.mxu0 %v2895_v41  ;;  %v2951_v21 = vld [vmem:[#allocation5 + $0x484] ss:$16 sps:$4 sm:$0xff]   ;;  %v2949_v23 = vld [vmem:[#allocation5 + $0x480] ss:$16 sps:$4 sm:$0xff]   ;;  %v3456_v41 = vpack.c.bf16 %v74_v39, %v74_v39  ;;  %v3056_v39 = vld [vmem:[#allocation5 + $0x26c] ss:$16 sps:$4 sm:$0xff]  }
  0x50   :  { %1702 = vmatprep.subr.bf16.mxu1 %v2897_v42  ;;  %v2954_v22 = vld [vmem:[#allocation5 + $0x684] ss:$16 sps:$4 sm:$0xff]   ;;  %v2952_v24 = vld [vmem:[#allocation5 + $0x680] ss:$16 sps:$4 sm:$0xff]  }
  0x51   :  { %v2957_v25 = vld [vmem:[#allocation5 + $0x464] ss:$16 sps:$4 sm:$0xff]   ;;  %v2955_v27 = vld [vmem:[#allocation5 + $0x460] ss:$16 sps:$4 sm:$0xff]  }
  0x52   :  { %1662 = vmatpush2.bf16.msra.mxu0 %v2899_v43  ;;  %v2960_v26 = vld [vmem:[#allocation5 + $0x664] ss:$16 sps:$4 sm:$0xff]   ;;  %v2958_v28 = vld [vmem:[#allocation5 + $0x660] ss:$16 sps:$4 sm:$0xff]  }
  0x53   :  { %1703 = vmatpush2.bf16.msra.mxu1 %v2900_v44  ;;  %1663 = vmatprep.subr.bf16.mxu0 %v2901_v45  ;;  %v2963_v29 = vld [vmem:[#allocation5 + $0x444] ss:$16 sps:$4 sm:$0xff]   ;;  %v2961_v31 = vld [vmem:[#allocation5 + $0x440] ss:$16 sps:$4 sm:$0xff]  }
  0x54   :  { %1704 = vmatprep.subr.bf16.mxu1 %v2903_v46  ;;  %v2966_v30 = vld [vmem:[#allocation5 + $0x644] ss:$16 sps:$4 sm:$0xff]   ;;  %v2964_v32 = vld [vmem:[#allocation5 + $0x640] ss:$16 sps:$4 sm:$0xff]  }
  0x55   :  { %v2969_v33 = vld [vmem:[#allocation5 + $0x424] ss:$16 sps:$4 sm:$0xff]   ;;  %v2967_v36 = vld [vmem:[#allocation5 + $0x420] ss:$16 sps:$4 sm:$0xff]  }
  0x56   :  { %1664 = vmatpush2.bf16.msra.mxu0 %v2905_v48  ;;  %v2972_v34 = vld [vmem:[#allocation5 + $0x624] ss:$16 sps:$4 sm:$0xff]   ;;  %v2970_v37 = vld [vmem:[#allocation5 + $0x620] ss:$16 sps:$4 sm:$0xff]  }
  0x57   :  { %1705 = vmatpush2.bf16.msra.mxu1 %v2906_v49  ;;  %1665 = vmatprep.subr.bf16.mxu0 %v2907_v52  ;;  %v2975_v40 = vld [vmem:[#allocation5 + $0x404] ss:$16 sps:$4 sm:$0xff]   ;;  %v2973_v43 = vld [vmem:[#allocation5 + $0x400] ss:$16 sps:$4 sm:$0xff]  }
  0x58   :  { %1706 = vmatprep.subr.bf16.mxu1 %v2909_v54  ;;  %v2978_v42 = vld [vmem:[#allocation5 + $0x604] ss:$16 sps:$4 sm:$0xff]   ;;  %v2976_v44 = vld [vmem:[#allocation5 + $0x600] ss:$16 sps:$4 sm:$0xff]  }
  0x59   :  { %v2981_v45 = vld [vmem:[#allocation5 + $0x5e4] ss:$16 sps:$4 sm:$0xff]   ;;  %v2979_v47 = vld [vmem:[#allocation5 + $0x5e0] ss:$16 sps:$4 sm:$0xff]  }
  0x5a   :  { %1666 = vmatpush2.bf16.msra.mxu0 %v2911_v55  ;;  %v2984_v46 = vld [vmem:[#allocation5 + $0x7e4] ss:$16 sps:$4 sm:$0xff]   ;;  %v2982_v48 = vld [vmem:[#allocation5 + $0x7e0] ss:$16 sps:$4 sm:$0xff]  }
  0x5b   :  { %1707 = vmatpush2.bf16.msra.mxu1 %v2912_v56  ;;  %1667 = vmatprep.subr.bf16.mxu0 %v2913_v57  ;;  %v2987_v49 = vld [vmem:[#allocation5 + $0x5c4] ss:$16 sps:$4 sm:$0xff]   ;;  %v2985_v52 = vld [vmem:[#allocation5 + $0x5c0] ss:$16 sps:$4 sm:$0xff]  }
  0x5c   :  { %1708 = vmatprep.subr.bf16.mxu1 %v2915_v58  ;;  %v2990_v51 = vld [vmem:[#allocation5 + $0x7c4] ss:$16 sps:$4 sm:$0xff]   ;;  %v2988_v54 = vld [vmem:[#allocation5 + $0x7c0] ss:$16 sps:$4 sm:$0xff]  }
  0x5d   :  { %v2993_v55 = vld [vmem:[#allocation5 + $0x5a4] ss:$16 sps:$4 sm:$0xff]   ;;  %v2991_v57 = vld [vmem:[#allocation5 + $0x5a0] ss:$16 sps:$4 sm:$0xff]  }
  0x5e   :  { %1668 = vmatpush2.bf16.msra.mxu0 %v2917_v59  ;;  %v2996_v56 = vld [vmem:[#allocation5 + $0x7a4] ss:$16 sps:$4 sm:$0xff]   ;;  %v2994_v58 = vld [vmem:[#allocation5 + $0x7a0] ss:$16 sps:$4 sm:$0xff]  }
  0x5f   :  { %1709 = vmatpush2.bf16.msra.mxu1 %v2918_v60  ;;  %1669 = vmatprep.subr.bf16.mxu0 %v2919_v61  ;;  %v2999_v59 = vld [vmem:[#allocation5 + $0x584] ss:$16 sps:$4 sm:$0xff]   ;;  %v2997_v61 = vld [vmem:[#allocation5 + $0x580] ss:$16 sps:$4 sm:$0xff]  }
  0x60   :  { %1710 = vmatprep.subr.bf16.mxu1 %v2921_v62  ;;  %v3002_v60 = vld [vmem:[#allocation5 + $0x784] ss:$16 sps:$4 sm:$0xff]   ;;  %v3000_v62 = vld [vmem:[#allocation5 + $0x780] ss:$16 sps:$4 sm:$0xff]  }
  0x61   :  { %v3009_v5 = vld [vmem:[#allocation5 + $0x540] ss:$16 sps:$4 sm:$0xff]  }
  0x62   :  { %1670 = vmatpush2.bf16.msra.mxu0 %v2923_v63  ;;  %v3005_v63 = vld [vmem:[#allocation5 + $0x564] ss:$16 sps:$4 sm:$0xff]   ;;  %v3012_v6 = vld [vmem:[#allocation5 + $0x740] ss:$16 sps:$4 sm:$0xff]  }
  0x63   :  { %1711 = vmatpush2.bf16.msra.mxu1 %v2924_v0  ;;  %1671 = vmatprep.subr.bf16.mxu0 %v2925_v1  ;;  %v3008_v0 = vld [vmem:[#allocation5 + $0x764] ss:$16 sps:$4 sm:$0xff]   ;;  %v3003_v1 = vld [vmem:[#allocation5 + $0x560] ss:$16 sps:$4 sm:$0xff]  }
  0x64   :  { %1712 = vmatprep.subr.bf16.mxu1 %v2927_v2  ;;  %v3006_v2 = vld [vmem:[#allocation5 + $0x760] ss:$16 sps:$4 sm:$0xff]  }
  0x66   :  { %1672 = vmatpush2.bf16.msra.mxu0 %v2929_v3  ;;  %v3011_v3 = vld [vmem:[#allocation5 + $0x544] ss:$16 sps:$4 sm:$0xff]  }
  0x67   :  { %1713 = vmatpush2.bf16.msra.mxu1 %v2930_v4  ;;  %1723 = vmatprep.subr.bf16.mxu0 %v2933_v7  ;;  %v3014_v4 = vld [vmem:[#allocation5 + $0x744] ss:$16 sps:$4 sm:$0xff]  }
  0x68   :  { %1764 = vmatprep.subr.bf16.mxu1 %v2936_v8  ;;  %v3017_v7 = vld [vmem:[#allocation5 + $0x524] ss:$16 sps:$4 sm:$0xff]  }
  0x69   :  { %1674 = vmatmul.mubr.bf16.vlgmr.msra.gmra.mxu0 %v3448_v9  ;;  %v3020_v8 = vld [vmem:[#allocation5 + $0x724] ss:$16 sps:$4 sm:$0xff]  }
  0x6a   :  { %1715 = vmatmul.mubr.bf16.vlgmr.msra.gmra.mxu1 %v3450_v10  ;;  %1724 = vmatpush1.bf16.msra.mxu0 %v2931_v11  ;;  %v3015_v11 = vld [vmem:[#allocation5 + $0x520] ss:$16 sps:$4 sm:$0xff]  }
  0x6b   :  { %1765 = vmatpush1.bf16.msra.mxu1 %v2934_v12  ;;  %1725 = vmatprep.subr.bf16.mxu0 %v2939_v13  ;;  %v3018_v12 = vld [vmem:[#allocation5 + $0x720] ss:$16 sps:$4 sm:$0xff]   ;;  %v3023_v13 = vld [vmem:[#allocation5 + $0x504] ss:$16 sps:$4 sm:$0xff]  }
  0x6c   :  { %1766 = vmatprep.subr.bf16.mxu1 %v2942_v14  ;;  %1755 = vmatprep.mubr.bf16.mxu0 %v3454_v38  ;;  %v3026_v14 = vld [vmem:[#allocation5 + $0x704] ss:$16 sps:$4 sm:$0xff]  }
  0x6d   :  { %1796 = vmatprep.mubr.bf16.mxu1 %v3456_v41 }
  0x6e   :  { %1726 = vmatpush1.bf16.msra.mxu0 %v2937_v15  ;;  %v3021_v15 = vld [vmem:[#allocation5 + $0x500] ss:$16 sps:$4 sm:$0xff]  }
  0x6f   :  { %1767 = vmatpush1.bf16.msra.mxu1 %v2940_v16  ;;  %1727 = vmatprep.subr.bf16.mxu0 %v2945_v17  ;;  %v3024_v16 = vld [vmem:[#allocation5 + $0x700] ss:$16 sps:$4 sm:$0xff]  }
  0x70   :  { %1768 = vmatprep.subr.bf16.mxu1 %v2948_v18  ;;  %v71_v17 = vld [vmem:[#allocation3 + $0x20] sm:$0xff]  ;;  %v73_v18 = vld [vmem:[#allocation3 + $0x30] sm:$0xff] }
  0x72   :  { %1728 = vmatpush1.bf16.msra.mxu0 %v2943_v19  ;;  %v3029_v19 = vld [vmem:[#allocation5 + $0xec] ss:$16 sps:$4 sm:$0xff]  }
  0x73   :  { %1769 = vmatpush1.bf16.msra.mxu1 %v2946_v20  ;;  %1729 = vmatprep.subr.bf16.mxu0 %v2951_v21  ;;  %v3032_v20 = vld [vmem:[#allocation5 + $0x2ec] ss:$16 sps:$4 sm:$0xff]   ;;  %v3460_v21 = vpack.c.bf16 %v71_v17, %v71_v17 }
  0x74   :  { %1770 = vmatprep.subr.bf16.mxu1 %v2954_v22  ;;  %v3462_v22 = vpack.c.bf16 %v73_v18, %v73_v18  ;;  %v3113_v17 = vld [vmem:[#allocation5 + $0x12c] ss:$16 sps:$4 sm:$0xff]  }
  0x75   :  { %v3116_v18 = vld [vmem:[#allocation5 + $0x32c] ss:$16 sps:$4 sm:$0xff]  }
  0x76   :  { %1730 = vmatpush1.bf16.msra.mxu0 %v2949_v23  ;;  %v3027_v23 = vld [vmem:[#allocation5 + $0xe8] ss:$16 sps:$4 sm:$0xff]  }
  0x77   :  { %1771 = vmatpush1.bf16.msra.mxu1 %v2952_v24  ;;  %1731 = vmatprep.subr.bf16.mxu0 %v2957_v25  ;;  %v3030_v24 = vld [vmem:[#allocation5 + $0x2e8] ss:$16 sps:$4 sm:$0xff]   ;;  %v3035_v25 = vld [vmem:[#allocation5 + $0xcc] ss:$16 sps:$4 sm:$0xff]  }
  0x78   :  { %1772 = vmatprep.subr.bf16.mxu1 %v2960_v26  ;;  %v3038_v26 = vld [vmem:[#allocation5 + $0x2cc] ss:$16 sps:$4 sm:$0xff]  }
  0x7a   :  { %1732 = vmatpush1.bf16.msra.mxu0 %v2955_v27  ;;  %v3033_v27 = vld [vmem:[#allocation5 + $0xc8] ss:$16 sps:$4 sm:$0xff]  }
  0x7b   :  { %1773 = vmatpush1.bf16.msra.mxu1 %v2958_v28  ;;  %1733 = vmatprep.subr.bf16.mxu0 %v2963_v29  ;;  %v3036_v28 = vld [vmem:[#allocation5 + $0x2c8] ss:$16 sps:$4 sm:$0xff]   ;;  %v3041_v29 = vld [vmem:[#allocation5 + $0xac] ss:$16 sps:$4 sm:$0xff]  }
  0x7c   :  { %1774 = vmatprep.subr.bf16.mxu1 %v2966_v30  ;;  %v3044_v30 = vld [vmem:[#allocation5 + $0x2ac] ss:$16 sps:$4 sm:$0xff]  }
  0x7e   :  { %1734 = vmatpush1.bf16.msra.mxu0 %v2961_v31  ;;  %v3039_v31 = vld [vmem:[#allocation5 + $0xa8] ss:$16 sps:$4 sm:$0xff]  }
  0x7f   :  { %1775 = vmatpush1.bf16.msra.mxu1 %v2964_v32  ;;  %1735 = vmatprep.subr.bf16.mxu0 %v2969_v33  ;;  %v3042_v32 = vld [vmem:[#allocation5 + $0x2a8] ss:$16 sps:$4 sm:$0xff]   ;;  %v3047_v33 = vld [vmem:[#allocation5 + $0x8c] ss:$16 sps:$4 sm:$0xff]  }
  0x80   :  { %1776 = vmatprep.subr.bf16.mxu1 %v2972_v34  ;;  %v3050_v34 = vld [vmem:[#allocation5 + $0x28c] ss:$16 sps:$4 sm:$0xff]  }
  0x82   :  { %1736 = vmatpush1.bf16.msra.mxu0 %v2967_v36  ;;  %v3048_v36 = vld [vmem:[#allocation5 + $0x288] ss:$16 sps:$4 sm:$0xff]  }
  0x83   :  { %1777 = vmatpush1.bf16.msra.mxu1 %v2970_v37  ;;  %1737 = vmatprep.subr.bf16.mxu0 %v2975_v40  ;;  %v3053_v37 = vld [vmem:[#allocation5 + $0x6c] ss:$16 sps:$4 sm:$0xff]   ;;  %v3051_v40 = vld [vmem:[#allocation5 + $0x68] ss:$16 sps:$4 sm:$0xff]  }
  0x84   :  { %1778 = vmatprep.subr.bf16.mxu1 %v2978_v42  ;;  %v3062_v42 = vld [vmem:[#allocation5 + $0x24c] ss:$16 sps:$4 sm:$0xff]  }
  0x86   :  { %1738 = vmatpush1.bf16.msra.mxu0 %v2973_v43  ;;  %v3057_v43 = vld [vmem:[#allocation5 + $0x48] ss:$16 sps:$4 sm:$0xff]  }
  0x87   :  { %1779 = vmatpush1.bf16.msra.mxu1 %v2976_v44  ;;  %1739 = vmatprep.subr.bf16.mxu0 %v2981_v45  ;;  %v3060_v44 = vld [vmem:[#allocation5 + $0x248] ss:$16 sps:$4 sm:$0xff]   ;;  %v3065_v45 = vld [vmem:[#allocation5 + $0x2c] ss:$16 sps:$4 sm:$0xff]  }
  0x88   :  { %1780 = vmatprep.subr.bf16.mxu1 %v2984_v46  ;;  %v3068_v46 = vld [vmem:[#allocation5 + $0x22c] ss:$16 sps:$4 sm:$0xff]  }
  0x8a   :  { %1740 = vmatpush2.bf16.msra.mxu0 %v2979_v47  ;;  %v3063_v47 = vld [vmem:[#allocation5 + $0x28] ss:$16 sps:$4 sm:$0xff]  }
  0x8b   :  { %1781 = vmatpush2.bf16.msra.mxu1 %v2982_v48  ;;  %1741 = vmatprep.subr.bf16.mxu0 %v2987_v49  ;;  %v3066_v48 = vld [vmem:[#allocation5 + $0x228] ss:$16 sps:$4 sm:$0xff]   ;;  %v3071_v49 = vld [vmem:[#allocation5 + $0xc] ss:$16 sps:$4 sm:$0xff]  }
  0x8c   :  { %1782 = vmatprep.subr.bf16.mxu1 %v2990_v51  ;;  %v3074_v51 = vld [vmem:[#allocation5 + $0x20c] ss:$16 sps:$4 sm:$0xff]  }
  0x8e   :  { %1742 = vmatpush2.bf16.msra.mxu0 %v2985_v52  ;;  %v3069_v52 = vld [vmem:[#allocation5 + $0x8] ss:$16 sps:$4 sm:$0xff]  }
  0x8f   :  { %1783 = vmatpush2.bf16.msra.mxu1 %v2988_v54  ;;  %1743 = vmatprep.subr.bf16.mxu0 %v2993_v55  ;;  %v3072_v54 = vld [vmem:[#allocation5 + $0x208] ss:$16 sps:$4 sm:$0xff]   ;;  %v3077_v55 = vld [vmem:[#allocation5 + $0x1ec] ss:$16 sps:$4 sm:$0xff]  }
  0x90   :  { %1784 = vmatprep.subr.bf16.mxu1 %v2996_v56  ;;  %v3080_v56 = vld [vmem:[#allocation5 + $0x3ec] ss:$16 sps:$4 sm:$0xff]  }
  0x92   :  { %1744 = vmatpush2.bf16.msra.mxu0 %v2991_v57  ;;  %v3075_v57 = vld [vmem:[#allocation5 + $0x1e8] ss:$16 sps:$4 sm:$0xff]  }
  0x93   :  { %1785 = vmatpush2.bf16.msra.mxu1 %v2994_v58  ;;  %1745 = vmatprep.subr.bf16.mxu0 %v2999_v59  ;;  %v3078_v58 = vld [vmem:[#allocation5 + $0x3e8] ss:$16 sps:$4 sm:$0xff]   ;;  %v3083_v59 = vld [vmem:[#allocation5 + $0x1cc] ss:$16 sps:$4 sm:$0xff]  }
  0x94   :  { %1786 = vmatprep.subr.bf16.mxu1 %v3002_v60  ;;  %v3086_v60 = vld [vmem:[#allocation5 + $0x3cc] ss:$16 sps:$4 sm:$0xff]  }
  0x96   :  { %1746 = vmatpush2.bf16.msra.mxu0 %v2997_v61  ;;  %v3081_v61 = vld [vmem:[#allocation5 + $0x1c8] ss:$16 sps:$4 sm:$0xff]  }
  0x97   :  { %1787 = vmatpush2.bf16.msra.mxu1 %v3000_v62  ;;  %1747 = vmatprep.subr.bf16.mxu0 %v3005_v63  ;;  %v3084_v62 = vld [vmem:[#allocation5 + $0x3c8] ss:$16 sps:$4 sm:$0xff]   ;;  %v3089_v63 = vld [vmem:[#allocation5 + $0x1ac] ss:$16 sps:$4 sm:$0xff]  }
  0x98   :  { %1788 = vmatprep.subr.bf16.mxu1 %v3008_v0  ;;  %v3092_v0 = vld [vmem:[#allocation5 + $0x3ac] ss:$16 sps:$4 sm:$0xff]  }
  0x9a   :  { %1748 = vmatpush2.bf16.msra.mxu0 %v3003_v1  ;;  %v3087_v1 = vld [vmem:[#allocation5 + $0x1a8] ss:$16 sps:$4 sm:$0xff]  }
  0x9b   :  { %1789 = vmatpush2.bf16.msra.mxu1 %v3006_v2  ;;  %1749 = vmatprep.subr.bf16.mxu0 %v3011_v3  ;;  %v3090_v2 = vld [vmem:[#allocation5 + $0x3a8] ss:$16 sps:$4 sm:$0xff]   ;;  %v3095_v3 = vld [vmem:[#allocation5 + $0x18c] ss:$16 sps:$4 sm:$0xff]  }
  0x9c   :  { %1790 = vmatprep.subr.bf16.mxu1 %v3014_v4  ;;  %v3098_v4 = vld [vmem:[#allocation5 + $0x38c] ss:$16 sps:$4 sm:$0xff]  }
  0x9e   :  { %1750 = vmatpush2.bf16.msra.mxu0 %v3009_v5  ;;  %v3093_v5 = vld [vmem:[#allocation5 + $0x188] ss:$16 sps:$4 sm:$0xff]  }
  0x9f   :  { %1791 = vmatpush2.bf16.msra.mxu1 %v3012_v6  ;;  %1751 = vmatprep.subr.bf16.mxu0 %v3017_v7  ;;  %v3096_v6 = vld [vmem:[#allocation5 + $0x388] ss:$16 sps:$4 sm:$0xff]   ;;  %v3101_v7 = vld [vmem:[#allocation5 + $0x16c] ss:$16 sps:$4 sm:$0xff]  }
  0xa0   :  { %1792 = vmatprep.subr.bf16.mxu1 %v3020_v8  ;;  %v3104_v8 = vld [vmem:[#allocation5 + $0x36c] ss:$16 sps:$4 sm:$0xff]  }
  0xa2   :  { %1752 = vmatpush2.bf16.msra.mxu0 %v3015_v11  ;;  %v3099_v11 = vld [vmem:[#allocation5 + $0x168] ss:$16 sps:$4 sm:$0xff]  }
  0xa3   :  { %1793 = vmatpush2.bf16.msra.mxu1 %v3018_v12  ;;  %1753 = vmatprep.subr.bf16.mxu0 %v3023_v13  ;;  %v3102_v12 = vld [vmem:[#allocation5 + $0x368] ss:$16 sps:$4 sm:$0xff]   ;;  %v3107_v13 = vld [vmem:[#allocation5 + $0x14c] ss:$16 sps:$4 sm:$0xff]  }
  0xa4   :  { %1794 = vmatprep.subr.bf16.mxu1 %v3026_v14  ;;  %v3110_v14 = vld [vmem:[#allocation5 + $0x34c] ss:$16 sps:$4 sm:$0xff]  }
  0xa6   :  { %1754 = vmatpush2.bf16.msra.mxu0 %v3021_v15  ;;  %v3105_v15 = vld [vmem:[#allocation5 + $0x148] ss:$16 sps:$4 sm:$0xff]  }
  0xa7   :  { %1795 = vmatpush2.bf16.msra.mxu1 %v3024_v16  ;;  %1805 = vmatprep.subr.bf16.mxu0 %v3029_v19  ;;  %v3108_v16 = vld [vmem:[#allocation5 + $0x348] ss:$16 sps:$4 sm:$0xff]  }
  0xa8   :  { %1846 = vmatprep.subr.bf16.mxu1 %v3032_v20  ;;  %v3111_v19 = vld [vmem:[#allocation5 + $0x128] ss:$16 sps:$4 sm:$0xff]  }
  0xa9   :  { %1756 = vmatmul.mubr.bf16.vlgmr.msra.gmra.mxu0 %v3460_v21  ;;  %v3114_v20 = vld [vmem:[#allocation5 + $0x328] ss:$16 sps:$4 sm:$0xff]  }
  0xaa   :  { %1797 = vmatmul.mubr.bf16.vlgmr.msra.gmra.mxu1 %v3462_v22  ;;  %1806 = vmatpush1.bf16.msra.mxu0 %v3027_v23  ;;  %v3119_v23 = vld [vmem:[#allocation5 + $0x10c] ss:$16 sps:$4 sm:$0xff]  }
  0xab   :  { %1847 = vmatpush1.bf16.msra.mxu1 %v3030_v24  ;;  %1807 = vmatprep.subr.bf16.mxu0 %v3035_v25  ;;  %v3122_v24 = vld [vmem:[#allocation5 + $0x30c] ss:$16 sps:$4 sm:$0xff]   ;;  %v3117_v25 = vld [vmem:[#allocation5 + $0x108] ss:$16 sps:$4 sm:$0xff]  }
  0xac   :  { %1848 = vmatprep.subr.bf16.mxu1 %v3038_v26  ;;  %1837 = vmatprep.mubr.bf16.mxu0 %v3442_v50  ;;  %v3054_v50 = vld [vmem:[#allocation5 + $0x268] ss:$16 sps:$4 sm:$0xff]  }
  0xad   :  { %1878 = vmatprep.mubr.bf16.mxu1 %v3444_v53  ;;  %v3059_v53 = vld [vmem:[#allocation5 + $0x4c] ss:$16 sps:$4 sm:$0xff]   ;;  %v3120_v26 = vld [vmem:[#allocation5 + $0x308] ss:$16 sps:$4 sm:$0xff]  }
  0xae   :  { %1808 = vmatpush1.bf16.msra.mxu0 %v3033_v27  ;;  %v3125_v27 = vld [vmem:[#allocation5 + $0x4ec] ss:$16 sps:$4 sm:$0xff]  }
  0xaf   :  { %1849 = vmatpush1.bf16.msra.mxu1 %v3036_v28  ;;  %1809 = vmatprep.subr.bf16.mxu0 %v3041_v29  ;;  %v3128_v28 = vld [vmem:[#allocation5 + $0x6ec] ss:$16 sps:$4 sm:$0xff]   ;;  %v3123_v29 = vld [vmem:[#allocation5 + $0x4e8] ss:$16 sps:$4 sm:$0xff]  }
  0xb0   :  { %1850 = vmatprep.subr.bf16.mxu1 %v3044_v30  ;;  %v3126_v30 = vld [vmem:[#allocation5 + $0x6e8] ss:$16 sps:$4 sm:$0xff]  }
  0xb2   :  { %1810 = vmatpush1.bf16.msra.mxu0 %v3039_v31  ;;  %v3131_v31 = vld [vmem:[#allocation5 + $0x4cc] ss:$16 sps:$4 sm:$0xff]  }
  0xb3   :  { %1851 = vmatpush1.bf16.msra.mxu1 %v3042_v32  ;;  %1811 = vmatprep.subr.bf16.mxu0 %v3047_v33  ;;  %v3134_v32 = vld [vmem:[#allocation5 + $0x6cc] ss:$16 sps:$4 sm:$0xff]   ;;  %v3129_v33 = vld [vmem:[#allocation5 + $0x4c8] ss:$16 sps:$4 sm:$0xff]  }
  0xb4   :  { %1852 = vmatprep.subr.bf16.mxu1 %v3050_v34  ;;  %v3132_v34 = vld [vmem:[#allocation5 + $0x6c8] ss:$16 sps:$4 sm:$0xff]  }
  0xb6   :  { %1812 = vmatpush1.bf16.msra.mxu0 %v3045_v35  ;;  %v3137_v35 = vld [vmem:[#allocation5 + $0x4ac] ss:$16 sps:$4 sm:$0xff]  }
  0xb7   :  { %1853 = vmatpush1.bf16.msra.mxu1 %v3048_v36  ;;  %1813 = vmatprep.subr.bf16.mxu0 %v3053_v37  ;;  %v3140_v36 = vld [vmem:[#allocation5 + $0x6ac] ss:$16 sps:$4 sm:$0xff]   ;;  %v3135_v37 = vld [vmem:[#allocation5 + $0x4a8] ss:$16 sps:$4 sm:$0xff]  }
  0xb8   :  { %1854 = vmatprep.subr.bf16.mxu1 %v3056_v39  ;;  %v3138_v39 = vld [vmem:[#allocation5 + $0x6a8] ss:$16 sps:$4 sm:$0xff]  }
  0xba   :  { %1814 = vmatpush1.bf16.msra.mxu0 %v3051_v40  ;;  %v3143_v40 = vld [vmem:[#allocation5 + $0x48c] ss:$16 sps:$4 sm:$0xff]  }
  0xbb   :  { %1855 = vmatpush1.bf16.msra.mxu1 %v3054_v50  ;;  %1815 = vmatprep.subr.bf16.mxu0 %v3059_v53  ;;  %v3146_v50 = vld [vmem:[#allocation5 + $0x68c] ss:$16 sps:$4 sm:$0xff]  }
  0xbc   :  { %1856 = vmatprep.subr.bf16.mxu1 %v3062_v42  ;;  %v3149_v53 = vld [vmem:[#allocation5 + $0x46c] ss:$16 sps:$4 sm:$0xff]  }
  0xbd   :  { %v3152_v42 = vld [vmem:[#allocation5 + $0x66c] ss:$16 sps:$4 sm:$0xff]  }
  0xbe   :  { %1816 = vmatpush1.bf16.msra.mxu0 %v3057_v43  ;;  %v3147_v43 = vld [vmem:[#allocation5 + $0x468] ss:$16 sps:$4 sm:$0xff]  }
  0xbf   :  { %1857 = vmatpush1.bf16.msra.mxu1 %v3060_v44  ;;  %1817 = vmatprep.subr.bf16.mxu0 %v3065_v45  ;;  %v3158_v44 = vld [vmem:[#allocation5 + $0x64c] ss:$16 sps:$4 sm:$0xff]   ;;  %v3153_v45 = vld [vmem:[#allocation5 + $0x448] ss:$16 sps:$4 sm:$0xff]  }
  0xc0   :  { %1858 = vmatprep.subr.bf16.mxu1 %v3068_v46  ;;  %v3156_v46 = vld [vmem:[#allocation5 + $0x648] ss:$16 sps:$4 sm:$0xff]  }
  0xc2   :  { %1818 = vmatpush1.bf16.msra.mxu0 %v3063_v47  ;;  %v3161_v47 = vld [vmem:[#allocation5 + $0x42c] ss:$16 sps:$4 sm:$0xff]  }
  0xc3   :  { %1859 = vmatpush1.bf16.msra.mxu1 %v3066_v48  ;;  %1819 = vmatprep.subr.bf16.mxu0 %v3071_v49  ;;  %v3164_v48 = vld [vmem:[#allocation5 + $0x62c] ss:$16 sps:$4 sm:$0xff]   ;;  %v3159_v49 = vld [vmem:[#allocation5 + $0x428] ss:$16 sps:$4 sm:$0xff]  }
  0xc4   :  { %1860 = vmatprep.subr.bf16.mxu1 %v3074_v51  ;;  %v3162_v51 = vld [vmem:[#allocation5 + $0x628] ss:$16 sps:$4 sm:$0xff]  }
  0xc6   :  { %1820 = vmatpush1.bf16.msra.mxu0 %v3069_v52  ;;  %v3167_v52 = vld [vmem:[#allocation5 + $0x40c] ss:$16 sps:$4 sm:$0xff]  }
  0xc7   :  { %1861 = vmatpush1.bf16.msra.mxu1 %v3072_v54  ;;  %1821 = vmatprep.subr.bf16.mxu0 %v3077_v55  ;;  %v3170_v54 = vld [vmem:[#allocation5 + $0x60c] ss:$16 sps:$4 sm:$0xff]   ;;  %v3165_v55 = vld [vmem:[#allocation5 + $0x408] ss:$16 sps:$4 sm:$0xff]  }
  0xc8   :  { %1862 = vmatprep.subr.bf16.mxu1 %v3080_v56  ;;  %v3168_v56 = vld [vmem:[#allocation5 + $0x608] ss:$16 sps:$4 sm:$0xff]  }
  0xca   :  { %1822 = vmatpush2.bf16.msra.mxu0 %v3075_v57  ;;  %v3173_v57 = vld [vmem:[#allocation5 + $0x5ec] ss:$16 sps:$4 sm:$0xff]  }
  0xcb   :  { %1863 = vmatpush2.bf16.msra.mxu1 %v3078_v58  ;;  %1823 = vmatprep.subr.bf16.mxu0 %v3083_v59  ;;  %v3176_v58 = vld [vmem:[#allocation5 + $0x7ec] ss:$16 sps:$4 sm:$0xff]   ;;  %v3171_v59 = vld [vmem:[#allocation5 + $0x5e8] ss:$16 sps:$4 sm:$0xff]  }
  0xcc   :  { %1864 = vmatprep.subr.bf16.mxu1 %v3086_v60  ;;  %v3174_v60 = vld [vmem:[#allocation5 + $0x7e8] ss:$16 sps:$4 sm:$0xff]  }
  0xce   :  { %1824 = vmatpush2.bf16.msra.mxu0 %v3081_v61  ;;  %v3179_v61 = vld [vmem:[#allocation5 + $0x5cc] ss:$16 sps:$4 sm:$0xff]  }
  0xcf   :  { %1865 = vmatpush2.bf16.msra.mxu1 %v3084_v62  ;;  %1825 = vmatprep.subr.bf16.mxu0 %v3089_v63  ;;  %v3182_v62 = vld [vmem:[#allocation5 + $0x7cc] ss:$16 sps:$4 sm:$0xff]   ;;  %v3177_v63 = vld [vmem:[#allocation5 + $0x5c8] ss:$16 sps:$4 sm:$0xff]  }
  0xd0   :  { %1866 = vmatprep.subr.bf16.mxu1 %v3092_v0  ;;  %v3180_v0 = vld [vmem:[#allocation5 + $0x7c8] ss:$16 sps:$4 sm:$0xff]  }
  0xd2   :  { %1826 = vmatpush2.bf16.msra.mxu0 %v3087_v1  ;;  %v3185_v1 = vld [vmem:[#allocation5 + $0x5ac] ss:$16 sps:$4 sm:$0xff]  }
  0xd3   :  { %1867 = vmatpush2.bf16.msra.mxu1 %v3090_v2  ;;  %1827 = vmatprep.subr.bf16.mxu0 %v3095_v3  ;;  %v3188_v2 = vld [vmem:[#allocation5 + $0x7ac] ss:$16 sps:$4 sm:$0xff]   ;;  %v3183_v3 = vld [vmem:[#allocation5 + $0x5a8] ss:$16 sps:$4 sm:$0xff]  }
  0xd4   :  { %1868 = vmatprep.subr.bf16.mxu1 %v3098_v4  ;;  %v3186_v4 = vld [vmem:[#allocation5 + $0x7a8] ss:$16 sps:$4 sm:$0xff]  }
  0xd6   :  { %1828 = vmatpush2.bf16.msra.mxu0 %v3093_v5  ;;  %v3191_v5 = vld [vmem:[#allocation5 + $0x58c] ss:$16 sps:$4 sm:$0xff]  }
  0xd7   :  { %1869 = vmatpush2.bf16.msra.mxu1 %v3096_v6  ;;  %1829 = vmatprep.subr.bf16.mxu0 %v3101_v7  ;;  %v3194_v6 = vld [vmem:[#allocation5 + $0x78c] ss:$16 sps:$4 sm:$0xff]   ;;  %v3189_v7 = vld [vmem:[#allocation5 + $0x588] ss:$16 sps:$4 sm:$0xff]  }
  0xd8   :  { %1870 = vmatprep.subr.bf16.mxu1 %v3104_v8  ;;  %v3192_v8 = vld [vmem:[#allocation5 + $0x788] ss:$16 sps:$4 sm:$0xff]  }
  0xda   :  { %1830 = vmatpush2.bf16.msra.mxu0 %v3099_v11  ;;  %v3197_v11 = vld [vmem:[#allocation5 + $0x56c] ss:$16 sps:$4 sm:$0xff]  }
  0xdb   :  { %1871 = vmatpush2.bf16.msra.mxu1 %v3102_v12  ;;  %1831 = vmatprep.subr.bf16.mxu0 %v3107_v13  ;;  %v3200_v12 = vld [vmem:[#allocation5 + $0x76c] ss:$16 sps:$4 sm:$0xff]   ;;  %v3195_v13 = vld [vmem:[#allocation5 + $0x568] ss:$16 sps:$4 sm:$0xff]  }
  0xdc   :  { %1872 = vmatprep.subr.bf16.mxu1 %v3110_v14  ;;  %v3198_v14 = vld [vmem:[#allocation5 + $0x768] ss:$16 sps:$4 sm:$0xff]  }
  0xde   :  { %1832 = vmatpush2.bf16.msra.mxu0 %v3105_v15  ;;  %v3203_v15 = vld [vmem:[#allocation5 + $0x54c] ss:$16 sps:$4 sm:$0xff]  }
  0xdf   :  { %1873 = vmatpush2.bf16.msra.mxu1 %v3108_v16  ;;  %1833 = vmatprep.subr.bf16.mxu0 %v3113_v17  ;;  %v3206_v16 = vld [vmem:[#allocation5 + $0x74c] ss:$16 sps:$4 sm:$0xff]   ;;  %v3201_v17 = vld [vmem:[#allocation5 + $0x548] ss:$16 sps:$4 sm:$0xff]  }
  0xe0   :  { %1874 = vmatprep.subr.bf16.mxu1 %v3116_v18  ;;  %v3204_v18 = vld [vmem:[#allocation5 + $0x748] ss:$16 sps:$4 sm:$0xff]  }
  0xe2   :  { %1834 = vmatpush2.bf16.msra.mxu0 %v3111_v19  ;;  %v3209_v19 = vld [vmem:[#allocation5 + $0x52c] ss:$16 sps:$4 sm:$0xff]  }
  0xe3   :  { %1875 = vmatpush2.bf16.msra.mxu1 %v3114_v20  ;;  %1835 = vmatprep.subr.bf16.mxu0 %v3119_v23  ;;  %v3212_v20 = vld [vmem:[#allocation5 + $0x72c] ss:$16 sps:$4 sm:$0xff]   ;;  %v3207_v23 = vld [vmem:[#allocation5 + $0x528] ss:$16 sps:$4 sm:$0xff]  }
  0xe4   :  { %1876 = vmatprep.subr.bf16.mxu1 %v3122_v24  ;;  %v3210_v24 = vld [vmem:[#allocation5 + $0x728] ss:$16 sps:$4 sm:$0xff]  }
  0xe6   :  { %1836 = vmatpush2.bf16.msra.mxu0 %v3117_v25  ;;  %v3215_v25 = vld [vmem:[#allocation5 + $0x50c] ss:$16 sps:$4 sm:$0xff]  }
  0xe7   :  { %1877 = vmatpush2.bf16.msra.mxu1 %v3120_v26  ;;  %1887 = vmatprep.subr.bf16.mxu0 %v3125_v27  ;;  %v3218_v26 = vld [vmem:[#allocation5 + $0x70c] ss:$16 sps:$4 sm:$0xff]   ;;  %v3213_v27 = vld [vmem:[#allocation5 + $0x508] ss:$16 sps:$4 sm:$0xff]  }
  0xe8   :  { %1928 = vmatprep.subr.bf16.mxu1 %v3128_v28  ;;  %v3216_v28 = vld [vmem:[#allocation5 + $0x708] ss:$16 sps:$4 sm:$0xff]  }
  0xe9   :  { %1838 = vmatmul.mubr.bf16.vlgmr.msra.gmra.mxu0 %v3448_v9  ;;  %v3141_v9 = vld [vmem:[#allocation5 + $0x488] ss:$16 sps:$4 sm:$0xff]  }
  0xea   :  { %1879 = vmatmul.mubr.bf16.vlgmr.msra.gmra.mxu1 %v3450_v10  ;;  %1888 = vmatpush1.bf16.msra.mxu0 %v3123_v29  ;;  %v3144_v10 = vld [vmem:[#allocation5 + $0x688] ss:$16 sps:$4 sm:$0xff]   ;;  %v3221_v29 = vld [vmem:[#allocation7 + $0x74] ss:$8 sps:$4 sm:$0xff]  }
  0xeb   :  { %1929 = vmatpush1.bf16.msra.mxu1 %v3126_v30  ;;  %1889 = vmatprep.subr.bf16.mxu0 %v3131_v31  ;;  %v3219_v30 = vld [vmem:[#allocation7 + $0x70] ss:$8 sps:$4 sm:$0xff]   ;;  %v3224_v31 = vld [vmem:[#allocation7 + $0x64] ss:$8 sps:$4 sm:$0xff]  }
  0xec   :  { %1930 = vmatprep.subr.bf16.mxu1 %v3134_v32  ;;  %1919 = vmatprep.mubr.bf16.mxu0 %v3454_v38  ;;  %v3150_v38 = vld [vmem:[#allocation5 + $0x668] ss:$16 sps:$4 sm:$0xff]  }
  0xed   :  { %1960 = vmatprep.mubr.bf16.mxu1 %v3456_v41  ;;  %v3155_v41 = vld [vmem:[#allocation5 + $0x44c] ss:$16 sps:$4 sm:$0xff]  }
  0xee   :  { %1890 = vmatpush1.bf16.msra.mxu0 %v3129_v33 }
  0xef   :  { %1931 = vmatpush1.bf16.msra.mxu1 %v3132_v34  ;;  %1891 = vmatprep.subr.bf16.mxu0 %v3137_v35  ;;  %v3222_v34 = vld [vmem:[#allocation7 + $0x60] ss:$8 sps:$4 sm:$0xff]  }
  0xf0   :  { %1932 = vmatprep.subr.bf16.mxu1 %v3140_v36 }
  0xf2   :  { %1892 = vmatpush1.bf16.msra.mxu0 %v3135_v37  ;;  %v3227_v37 = vld [vmem:[#allocation7 + $0x54] ss:$8 sps:$4 sm:$0xff]  }
  0xf3   :  { %1933 = vmatpush1.bf16.msra.mxu1 %v3138_v39  ;;  %1893 = vmatprep.subr.bf16.mxu0 %v3143_v40 }
  0xf4   :  { %1934 = vmatprep.subr.bf16.mxu1 %v3146_v50  ;;  %v3225_v50 = vld [vmem:[#allocation7 + $0x50] ss:$8 sps:$4 sm:$0xff]  }
  0xf6   :  { %1894 = vmatpush1.bf16.msra.mxu0 %v3141_v9 }
  0xf7   :  { %1935 = vmatpush1.bf16.msra.mxu1 %v3144_v10  ;;  %1895 = vmatprep.subr.bf16.mxu0 %v3149_v53  ;;  %v3230_v53 = vld [vmem:[#allocation7 + $0x44] ss:$8 sps:$4 sm:$0xff]  }
  0xf8   :  { %1936 = vmatprep.subr.bf16.mxu1 %v3152_v42  ;;  %v3267_v42 = vld [vmem:[#allocation7 + $0x170] ss:$8 sps:$4 sm:$0xff]  }
  0xfa   :  { %1896 = vmatpush1.bf16.msra.mxu0 %v3147_v43  ;;  %v3272_v43 = vld [vmem:[#allocation7 + $0x164] ss:$8 sps:$4 sm:$0xff]  }
  0xfb   :  { %1937 = vmatpush1.bf16.msra.mxu1 %v3150_v38  ;;  %1897 = vmatprep.subr.bf16.mxu0 %v3155_v41  ;;  %v3270_v38 = vld [vmem:[#allocation7 + $0x160] ss:$8 sps:$4 sm:$0xff]   ;;  %v3233_v41 = vld [vmem:[#allocation7 + $0x34] ss:$8 sps:$4 sm:$0xff]  }
  0xfc   :  { %1938 = vmatprep.subr.bf16.mxu1 %v3158_v44  ;;  %v3275_v44 = vld [vmem:[#allocation7 + $0x154] ss:$8 sps:$4 sm:$0xff]  }
  0xfe   :  { %1898 = vmatpush1.bf16.msra.mxu0 %v3153_v45  ;;  %v3231_v45 = vld [vmem:[#allocation7 + $0x30] ss:$8 sps:$4 sm:$0xff]  }
  0xff   :  { %1939 = vmatpush1.bf16.msra.mxu1 %v3156_v46  ;;  %1899 = vmatprep.subr.bf16.mxu0 %v3161_v47  ;;  %v3273_v46 = vld [vmem:[#allocation7 + $0x150] ss:$8 sps:$4 sm:$0xff]   ;;  %v3236_v47 = vld [vmem:[#allocation7 + $0x24] ss:$8 sps:$4 sm:$0xff]  }
 0x100   :  { %1940 = vmatprep.subr.bf16.mxu1 %v3164_v48  ;;  %v3278_v48 = vld [vmem:[#allocation7 + $0x144] ss:$8 sps:$4 sm:$0xff]  }
 0x102   :  { %1900 = vmatpush1.bf16.msra.mxu0 %v3159_v49  ;;  %v3234_v49 = vld [vmem:[#allocation7 + $0x20] ss:$8 sps:$4 sm:$0xff]  }
 0x103   :  { %1941 = vmatpush1.bf16.msra.mxu1 %v3162_v51  ;;  %1901 = vmatprep.subr.bf16.mxu0 %v3167_v52  ;;  %v3276_v51 = vld [vmem:[#allocation7 + $0x140] ss:$8 sps:$4 sm:$0xff]   ;;  %v3239_v52 = vld [vmem:[#allocation7 + $0x14] ss:$8 sps:$4 sm:$0xff]  }
 0x104   :  { %1942 = vmatprep.subr.bf16.mxu1 %v3170_v54  ;;  %v3281_v54 = vld [vmem:[#allocation7 + $0x134] ss:$8 sps:$4 sm:$0xff]  }
 0x106   :  { %1902 = vmatpush1.bf16.msra.mxu0 %v3165_v55  ;;  %v3237_v55 = vld [vmem:[#allocation7 + $0x10] ss:$8 sps:$4 sm:$0xff]  }
 0x107   :  { %1943 = vmatpush1.bf16.msra.mxu1 %v3168_v56  ;;  %1903 = vmatprep.subr.bf16.mxu0 %v3173_v57  ;;  %v3279_v56 = vld [vmem:[#allocation7 + $0x130] ss:$8 sps:$4 sm:$0xff]   ;;  %v3242_v57 = vld [vmem:[#allocation7 + $0x4] ss:$8 sps:$4 sm:$0xff]  }
 0x108   :  { %1944 = vmatprep.subr.bf16.mxu1 %v3176_v58  ;;  %v3284_v58 = vld [vmem:[#allocation7 + $0x124] ss:$8 sps:$4 sm:$0xff]  }
 0x10a   :  { %1904 = vmatpush2.bf16.msra.mxu0 %v3171_v59  ;;  %v3240_v59 = vld [vmem:[#allocation7] ss:$8 sps:$4 sm:$0xff]  }
 0x10b   :  { %1945 = vmatpush2.bf16.msra.mxu1 %v3174_v60  ;;  %1905 = vmatprep.subr.bf16.mxu0 %v3179_v61  ;;  %v3282_v60 = vld [vmem:[#allocation7 + $0x120] ss:$8 sps:$4 sm:$0xff]   ;;  %v3245_v61 = vld [vmem:[#allocation7 + $0xf4] ss:$8 sps:$4 sm:$0xff]  }
 0x10c   :  { %1946 = vmatprep.subr.bf16.mxu1 %v3182_v62  ;;  %v3287_v62 = vld [vmem:[#allocation7 + $0x114] ss:$8 sps:$4 sm:$0xff]  }
 0x10e   :  { %1906 = vmatpush2.bf16.msra.mxu0 %v3177_v63  ;;  %v3243_v63 = vld [vmem:[#allocation7 + $0xf0] ss:$8 sps:$4 sm:$0xff]  }
 0x10f   :  { %1947 = vmatpush2.bf16.msra.mxu1 %v3180_v0  ;;  %1907 = vmatprep.subr.bf16.mxu0 %v3185_v1  ;;  %v3285_v0 = vld [vmem:[#allocation7 + $0x110] ss:$8 sps:$4 sm:$0xff]   ;;  %v3248_v1 = vld [vmem:[#allocation7 + $0xe4] ss:$8 sps:$4 sm:$0xff]  }
 0x110   :  { %1948 = vmatprep.subr.bf16.mxu1 %v3188_v2  ;;  %v3290_v2 = vld [vmem:[#allocation7 + $0x104] ss:$8 sps:$4 sm:$0xff]  }
 0x112   :  { %1908 = vmatpush2.bf16.msra.mxu0 %v3183_v3  ;;  %v3246_v3 = vld [vmem:[#allocation7 + $0xe0] ss:$8 sps:$4 sm:$0xff]  }
 0x113   :  { %1949 = vmatpush2.bf16.msra.mxu1 %v3186_v4  ;;  %1909 = vmatprep.subr.bf16.mxu0 %v3191_v5  ;;  %v3288_v4 = vld [vmem:[#allocation7 + $0x100] ss:$8 sps:$4 sm:$0xff]   ;;  %v3251_v5 = vld [vmem:[#allocation7 + $0xd4] ss:$8 sps:$4 sm:$0xff]  }
 0x114   :  { %1950 = vmatprep.subr.bf16.mxu1 %v3194_v6  ;;  %v3293_v6 = vld [vmem:[#allocation7 + $0x1f4] ss:$8 sps:$4 sm:$0xff]  }
 0x116   :  { %1910 = vmatpush2.bf16.msra.mxu0 %v3189_v7  ;;  %v3249_v7 = vld [vmem:[#allocation7 + $0xd0] ss:$8 sps:$4 sm:$0xff]  }
 0x117   :  { %1951 = vmatpush2.bf16.msra.mxu1 %v3192_v8  ;;  %1911 = vmatprep.subr.bf16.mxu0 %v3197_v11  ;;  %v3291_v8 = vld [vmem:[#allocation7 + $0x1f0] ss:$8 sps:$4 sm:$0xff]   ;;  %v3254_v11 = vld [vmem:[#allocation7 + $0xc4] ss:$8 sps:$4 sm:$0xff]  }
 0x118   :  { %1952 = vmatprep.subr.bf16.mxu1 %v3200_v12  ;;  %v3296_v12 = vld [vmem:[#allocation7 + $0x1e4] ss:$8 sps:$4 sm:$0xff]  }
 0x11a   :  { %1912 = vmatpush2.bf16.msra.mxu0 %v3195_v13  ;;  %v3252_v13 = vld [vmem:[#allocation7 + $0xc0] ss:$8 sps:$4 sm:$0xff]  }
 0x11b   :  { %1953 = vmatpush2.bf16.msra.mxu1 %v3198_v14  ;;  %1913 = vmatprep.subr.bf16.mxu0 %v3203_v15  ;;  %v3294_v14 = vld [vmem:[#allocation7 + $0x1e0] ss:$8 sps:$4 sm:$0xff]   ;;  %v3257_v15 = vld [vmem:[#allocation7 + $0xb4] ss:$8 sps:$4 sm:$0xff]  }
 0x11c   :  { %1954 = vmatprep.subr.bf16.mxu1 %v3206_v16  ;;  %v3299_v16 = vld [vmem:[#allocation7 + $0x1d4] ss:$8 sps:$4 sm:$0xff]  }
 0x11e   :  { %1914 = vmatpush2.bf16.msra.mxu0 %v3201_v17  ;;  %v341_v17 = vlaneseq }
 0x11f   :  { %1955 = vmatpush2.bf16.msra.mxu1 %v3204_v18  ;;  %1915 = vmatprep.subr.bf16.mxu0 %v3209_v19  ;;  %v3255_v18 = vld [vmem:[#allocation7 + $0xb0] ss:$8 sps:$4 sm:$0xff]  }
 0x120   :  { %1956 = vmatprep.subr.bf16.mxu1 %v3212_v20  ;;  %v3297_v19 = vld [vmem:[#allocation7 + $0x1d0] ss:$8 sps:$4 sm:$0xff]   ;;  %v3260_v20 = vld [vmem:[#allocation7 + $0xa4] ss:$8 sps:$4 sm:$0xff]  }
 0x122   :  { %1916 = vmatpush2.bf16.msra.mxu0 %v3207_v23  ;;  %v3302_v23 = vld [vmem:[#allocation7 + $0x1c4] ss:$8 sps:$4 sm:$0xff]  }
 0x123   :  { %1957 = vmatpush2.bf16.msra.mxu1 %v3210_v24  ;;  %1917 = vmatprep.subr.bf16.mxu0 %v3215_v25  ;;  %v3482_v24 = vshrl.u32 %v341_v17, 7  ;;  %v3258_v25 = vld [vmem:[#allocation7 + $0xa0] ss:$8 sps:$4 sm:$0xff]  }
 0x124   :  { %1958 = vmatprep.subr.bf16.mxu1 %v3218_v26  ;;  %v3300_v26 = vld [vmem:[#allocation7 + $0x1c0] ss:$8 sps:$4 sm:$0xff]  }
 0x126   :  { %1918 = vmatpush2.bf16.msra.mxu0 %v3213_v27  ;;  %v3263_v27 = vld [vmem:[#allocation7 + $0x94] ss:$8 sps:$4 sm:$0xff]  }
 0x127   :  { %1959 = vmatpush2.bf16.msra.mxu1 %v3216_v28  ;;  %2381 = vmatprep.subr.bf16.mxu0 %v3221_v29  ;;  %v3305_v28 = vld [vmem:[#allocation7 + $0x1b4] ss:$8 sps:$4 sm:$0xff]   ;;  %v3485_v29 = vsub.s32 0, %v3482_v24 }
 0x129   :  { %v3472_v32 = vpop.f32.mrf.mxu0  ;;  %1920 = vmatmul.mubr.bf16.vlgmr.msra.gmra.mxu0 %v3460_v21  ;;  %v3269_v21 = vld [vmem:[#allocation7 + $0x174] ss:$8 sps:$4 sm:$0xff]  }
 0x12a   :  { %v3474_v33 = vpop.f32.mrf.mxu1  ;;  %1961 = vmatmul.mubr.bf16.vlgmr.msra.gmra.mxu1 %v3462_v22  ;;  %2382 = vmatpush1.bf16.msra.mxu0 %v3219_v30  ;;  %v3228_v22 = vld [vmem:[#allocation7 + $0x40] ss:$8 sps:$4 sm:$0xff]  }
 0x12b   :  { %v3478_v35 = vpop.f32.mrf.mxu0  ;;  %2383 = vmatprep.subr.bf16.mxu0 %v3224_v31  ;;  %2422 = vmatprep.subr.bf16.mxu1 %v3269_v21  ;;  %v3490_v30 = vld [vmem:[%s3522_s2] sm:$0xf]  ;;  %v3493_v31 = vsub.s32 1, %v3482_v24  ;;  %v3308_v21 = vld [vmem:[#allocation7 + $0x1a4] ss:$8 sps:$4 sm:$0xff]  }
 0x12c   :  { %v3480_v36 = vpop.f32.mrf.mxu1  ;;  %2423 = vmatpush1.bf16.msra.mxu1 %v3267_v42 }
 0x12d   :  { %v1679_v39 = vpop.f32.mrf.mxu0  ;;  %2424 = vmatprep.subr.bf16.mxu1 %v3272_v43 }
 0x12e   :  { %v1720_v40 = vpop.f32.mrf.mxu1  ;;  %2384 = vmatpush1.bf16.msra.mxu0 %v3222_v34  ;;  %v3261_v34 = vld [vmem:[#allocation7 + $0x90] ss:$8 sps:$4 sm:$0xff]   ;;  %v3266_v39 = vld [vmem:[#allocation7 + $0x84] ss:$8 sps:$4 sm:$0xff]  }
 0x12f   :  { %v1680_v9 = vpop.f32.mrf.mxu0  ;;  %2385 = vmatprep.subr.bf16.mxu0 %v3227_v37  ;;  %v3303_v37 = vld [vmem:[#allocation7 + $0x1b0] ss:$8 sps:$4 sm:$0xff]   ;;  %v344_v40 = vrot.slane %v3490_v30, %v3485_v29 }
 0x130   :  { %v1721_v10 = vpop.f32.mrf.mxu1  ;;  %2425 = vmatpush1.bf16.msra.mxu1 %v3270_v38  ;;  %v3264_v9 = vld [vmem:[#allocation7 + $0x80] ss:$8 sps:$4 sm:$0xff]  }
 0x131   :  { %2426 = vmatprep.subr.bf16.mxu1 %v3275_v44  ;;  %v1676_v10 = vadd.f32 %v3472_v32, %v344_v40  ;;  %v3306_v38 = vld [vmem:[#allocation7 + $0x1a0] ss:$8 sps:$4 sm:$0xff]  }
 0x132   :  { %2386 = vmatpush1.bf16.msra.mxu0 %v3225_v50  ;;  %v348_v50 = vrot.slane %v3490_v30, %v3493_v31 }
 0x133   :  { %2387 = vmatprep.subr.bf16.mxu0 %v3230_v53  ;;  %v1717_v42 = vadd.f32 %v3474_v33, %v1676_v10 }
 0x134   :  { %2427 = vmatpush1.bf16.msra.mxu1 %v3273_v46  ;;  %v1678_v53 = vadd.f32 %v3478_v35, %v348_v50  ;;  %v3309_v35 = vld [vmem:[#allocation7 + $0x190] ss:$8 sps:$4 sm:$0xff]  }
 0x135   :  { %2428 = vmatprep.subr.bf16.mxu1 %v3278_v48 }
 0x136   :  { %2388 = vmatpush1.bf16.msra.mxu0 %v3228_v22 }
 0x137   :  { %2389 = vmatprep.subr.bf16.mxu0 %v3233_v41  ;;  %v1719_v41 = vadd.f32 %v3480_v36, %v1678_v53 }
 0x138   :  { %2429 = vmatpush1.bf16.msra.mxu1 %v3276_v51 }
 0x139   :  { %2430 = vmatprep.subr.bf16.mxu1 %v3281_v54 }
 0x13a   :  { %2390 = vmatpush1.bf16.msra.mxu0 %v3231_v45 }
 0x13b   :  { %2391 = vmatprep.subr.bf16.mxu0 %v3236_v47 }
 0x13c   :  { %2431 = vmatpush1.bf16.msra.mxu1 %v3279_v56  ;;  %v3314_v56 = vld [vmem:[#allocation7 + $0x184] ss:$8 sps:$4 sm:$0xff]  }
 0x13d   :  { %2432 = vmatprep.subr.bf16.mxu1 %v3284_v58  ;;  %v3312_v58 = vld [vmem:[#allocation7 + $0x180] ss:$8 sps:$4 sm:$0xff]  }
 0x13e   :  { %2392 = vmatpush1.bf16.msra.mxu0 %v3234_v49  ;;  %v3311_v49 = vld [vmem:[#allocation7 + $0x194] ss:$8 sps:$4 sm:$0xff]  }
 0x13f   :  { %2393 = vmatprep.subr.bf16.mxu0 %v3239_v52 }
 0x140   :  { %2433 = vmatpush1.bf16.msra.mxu1 %v3282_v60 }
 0x141   :  { %2434 = vmatprep.subr.bf16.mxu1 %v3287_v62 }
 0x142   :  { %2394 = vmatpush1.bf16.msra.mxu0 %v3237_v55 }
 0x143   :  { %2395 = vmatprep.subr.bf16.mxu0 %v3242_v57 }
 0x144   :  { %2435 = vmatpush1.bf16.msra.mxu1 %v3285_v0 }
 0x145   :  { %2436 = vmatprep.subr.bf16.mxu1 %v3290_v2 }
 0x146   :  { %2396 = vmatpush1.bf16.msra.mxu0 %v3240_v59 }
 0x147   :  { %2397 = vmatprep.subr.bf16.mxu0 %v3245_v61 }
 0x148   :  { %2437 = vmatpush1.bf16.msra.mxu1 %v3288_v4 }
 0x149   :  { %2438 = vmatprep.subr.bf16.mxu1 %v3293_v6  ;;  %v351_v6 = vsub.s32 2, %v3482_v24 }
 0x14a   :  { %2398 = vmatpush2.bf16.msra.mxu0 %v3243_v63 }
 0x14b   :  { %2399 = vmatprep.subr.bf16.mxu0 %v3248_v1 }
 0x14c   :  { %2439 = vmatpush2.bf16.msra.mxu1 %v3291_v8  ;;  %v352_v8 = vrot.slane %v3490_v30, %v351_v6 }
 0x14d   :  { %2440 = vmatprep.subr.bf16.mxu1 %v3296_v12 }
 0x14e   :  { %2400 = vmatpush2.bf16.msra.mxu0 %v3246_v3 }
 0x14f   :  { %2401 = vmatprep.subr.bf16.mxu0 %v3251_v5 }
 0x150   :  { %2441 = vmatpush2.bf16.msra.mxu1 %v3294_v14 }
 0x151   :  { %2442 = vmatprep.subr.bf16.mxu1 %v3299_v16 }
 0x152   :  { %2402 = vmatpush2.bf16.msra.mxu0 %v3249_v7  ;;  %v355_v7 = vsub.s32 3, %v3482_v24 }
 0x153   :  { %2403 = vmatprep.subr.bf16.mxu0 %v3254_v11 }
 0x154   :  { %2443 = vmatpush2.bf16.msra.mxu1 %v3297_v19  ;;  %v356_v11 = vrot.slane %v3490_v30, %v355_v7 }
 0x155   :  { %2444 = vmatprep.subr.bf16.mxu1 %v3302_v23 }
 0x156   :  { %2404 = vmatpush2.bf16.msra.mxu0 %v3252_v13 }
 0x157   :  { %2405 = vmatprep.subr.bf16.mxu0 %v3257_v15 }
 0x158   :  { %2445 = vmatpush2.bf16.msra.mxu1 %v3300_v26 }
 0x159   :  { %2446 = vmatprep.subr.bf16.mxu1 %v3305_v28 }
 0x15a   :  { %2406 = vmatpush2.bf16.msra.mxu0 %v3255_v18 }
 0x15b   :  { %2407 = vmatprep.subr.bf16.mxu0 %v3260_v20 }
 0x15c   :  { %2447 = vmatpush2.bf16.msra.mxu1 %v3303_v37 }
 0x15d   :  { %2448 = vmatprep.subr.bf16.mxu1 %v3308_v21 }
 0x15e   :  { %2408 = vmatpush2.bf16.msra.mxu0 %v3258_v25 }
 0x15f   :  { %2409 = vmatprep.subr.bf16.mxu0 %v3263_v27 }
 0x160   :  { %2449 = vmatpush2.bf16.msra.mxu1 %v3306_v38 }
 0x161   :  { %2450 = vmatprep.subr.bf16.mxu1 %v3311_v49 }
 0x162   :  { %2410 = vmatpush2.bf16.msra.mxu0 %v3261_v34 }
 0x163   :  { %2411 = vmatprep.subr.bf16.mxu0 %v3266_v39 }
 0x164   :  { %2451 = vmatpush2.bf16.msra.mxu1 %v3309_v35 }
 0x165   :  { %2452 = vmatprep.subr.bf16.mxu1 %v3314_v56 }
 0x166   :  { %2412 = vmatpush2.bf16.msra.mxu0 %v3264_v9 }
 0x168   :  { %2453 = vmatpush2.bf16.msra.mxu1 %v3312_v58 }
 0x169   :  { %v1757_v43 = vpop.f32.mrf.mxu0 }
 0x16a   :  { %v1798_v22 = vpop.f32.mrf.mxu1  ;;  %v1758_v44 = vadd.f32 %v1757_v43, %v1717_v42  ;;  %v2049_v43 = vld [vmem:[%s3524_s4] sm:$0x3] }
 0x16b   :  { %v1759_v45 = vpop.f32.mrf.mxu0  ;;  %v2058_v38 = vrot.slane %v2049_v43, %v3493_v31 }
 0x16c   :  { %v1800_v46 = vpop.f32.mrf.mxu1  ;;  %v1799_v47 = vadd.f32 %v1798_v22, %v1758_v44  ;;  %v1760_v48 = vadd.f32 %v1759_v45, %v1719_v41  ;;  %v2054_v22 = vrot.slane %v2049_v43, %v3485_v29 }
 0x16d   :  { %v1761_v32 = vpop.f32.mrf.mxu0 }
 0x16e   :  { %v1802_v51 = vpop.f32.mrf.mxu1  ;;  %vm1969_vm0 = vcmp.gt.f32.partialorder %v1799_v47, 0.0  ;;  %v1973_v52 = vmul.f32 0.2, %v1799_v47  ;;  %v1801_v33 = vadd.f32 %v1800_v46, %v1760_v48 }
 0x16f   :  { %v1762_v54 = vpop.f32.mrf.mxu0 }
 0x170   :  { %v1803_v55 = vpop.f32.mrf.mxu1  ;;  %vm1970_vm1 = vcmp.gt.f32.partialorder %v1801_v33, 0.0  ;;  %v1974_v36 = vmul.f32 0.2, %v1801_v33  ;;  %v1977_v57 = vsel %vm1969_vm0, %v1799_v47, %v1973_v52  ;;  %v2469_v47 = vld [vmem:[%s3525_s5] sm:$0x3] }
 0x171   :  { %v1981_v61 = vpack.c.bf16 %v1977_v57, %v1977_v57  ;;  %v2474_v35 = vrot.slane %v2469_v47, %v3485_v29  ;;  %v2478_v52 = vrot.slane %v2469_v47, %v3493_v31 }
 0x172   :  { %v1978_v59 = vsel %vm1970_vm1, %v1801_v33, %v1974_v36 }
 0x173   :  { %v1982_v60 = vpack.c.bf16 %v1978_v59, %v1978_v59  ;;  %v2827_v59 = vld [vmem:[#allocation2] ss:$0 sm:$0xff] }
 0x175   :  { %2413 = vmatprep.mubr.bf16.mxu0 %v1982_v60 }
 0x176   :  { %2414 = vmatmul.mubr.bf16.vlgmr.msra.gmra.mxu0 %v1981_v61 }
 0x1a9   :  { %v1839_v62 = vpop.f32.mrf.mxu0 }
 0x1aa   :  { %v1880_v63 = vpop.f32.mrf.mxu1  ;;  %v1840_v12 = vadd.f32 %v1839_v62, %v352_v8 }
 0x1ab   :  { %v1841_v0 = vpop.f32.mrf.mxu0 }
 0x1ac   :  { %v1882_v1 = vpop.f32.mrf.mxu1  ;;  %v1842_v13 = vadd.f32 %v1841_v0, %v356_v11  ;;  %v1881_v14 = vadd.f32 %v1880_v63, %v1840_v12 }
 0x1ad   :  { %v1843_v2 = vpop.f32.mrf.mxu0 }
 0x1ae   :  { %v1884_v3 = vpop.f32.mrf.mxu1  ;;  %v1883_v17 = vadd.f32 %v1882_v1, %v1842_v13 }
 0x1af   :  { %v1844_v4 = vpop.f32.mrf.mxu0 }
 0x1b0   :  { %v1885_v5 = vpop.f32.mrf.mxu1 }
 0x1e9   :  { %v1921_v15 = vpop.f32.mrf.mxu0 }
 0x1ea   :  { %v1962_v16 = vpop.f32.mrf.mxu1  ;;  %v1922_v18 = vadd.f32 %v1921_v15, %v1881_v14 }
 0x1eb   :  { %v1923_v19 = vpop.f32.mrf.mxu0 }
 0x1ec   :  { %v1964_v20 = vpop.f32.mrf.mxu1  ;;  %v1963_v23 = vadd.f32 %v1962_v16, %v1922_v18  ;;  %v1924_v25 = vadd.f32 %v1923_v19, %v1883_v17 }
 0x1ed   :  { %v1925_v26 = vpop.f32.mrf.mxu0 }
 0x1ee   :  { %v1966_v27 = vpop.f32.mrf.mxu1  ;;  %vm1971_vm2 = vcmp.gt.f32.partialorder %v1963_v23, 0.0  ;;  %v1975_v28 = vmul.f32 0.2, %v1963_v23  ;;  %v1965_v24 = vadd.f32 %v1964_v20, %v1924_v25 }
 0x1ef   :  { %v1926_v34 = vpop.f32.mrf.mxu0 }
 0x1f0   :  { %v1967_v37 = vpop.f32.mrf.mxu1  ;;  %vm1972_vm3 = vcmp.gt.f32.partialorder %v1965_v24, 0.0  ;;  %v1976_v30 = vmul.f32 0.2, %v1965_v24  ;;  %v1979_v39 = vsel %vm1971_vm2, %v1963_v23, %v1975_v28 }
 0x1f1   :  { %v1983_v9 = vpack.c.bf16 %v1979_v39, %v1979_v39 }
 0x1f2   :  { %v1980_v40 = vsel %vm1972_vm3, %v1965_v24, %v1976_v30 }
 0x1f3   :  { %v1984_v50 = vpack.c.bf16 %v1980_v40, %v1980_v40 }
 0x1f5   :  { %2454 = vmatprep.mubr.bf16.mxu1 %v1984_v50 }
 0x1f6   :  { %2455 = vmatmul.mubr.bf16.vlgmr.msra.gmra.mxu1 %v1983_v9 }
 0x236   :  { %v2415_v10 = vpop.f32.mrf.mxu0 }
 0x237   :  { %v2416_v41 = vadd.f32 %v2415_v10, %v2054_v22 }
 0x238   :  { %v2417_v53 = vpop.f32.mrf.mxu0 }
 0x239   :  { %v2418_v45 = vadd.f32 %v2417_v53, %v2058_v38 }
 0x23a   :  { %v2419_v42 = vpop.f32.mrf.mxu0 }
 0x23c   :  { %v2420_v21 = vpop.f32.mrf.mxu0 }
 0x2b6   :  { %v2456_v44 = vpop.f32.mrf.mxu1 }
 0x2b7   :  { %v2457_v46 = vadd.f32 %v2456_v44, %v2416_v41 }
 0x2b8   :  { %v2458_v48 = vpop.f32.mrf.mxu1 }
 0x2b9   :  { %vm2463_vm4 = vcmp.gt.f32.partialorder %v2457_v46, 0.0  ;;  %v2465_v49 = vmul.f32 0.2, %v2457_v46  ;;  %v2459_v32 = vadd.f32 %v2458_v48, %v2418_v45 }
 0x2ba   :  { %v2460_v51 = vpop.f32.mrf.mxu1 }
 0x2bb   :  { %vm2464_vm5 = vcmp.gt.f32.partialorder %v2459_v32, 0.0  ;;  %v2466_v33 = vmul.f32 0.2, %v2459_v32  ;;  %v2467_v54 = vsel %vm2463_vm4, %v2457_v46, %v2465_v49 }
 0x2bc   :  { %v2461_v55 = vpop.f32.mrf.mxu1  ;;  %v2481_v56 = vmul.f32 %v2474_v35, %v2467_v54 }
 0x2bd   :  { %v2468_v36 = vsel %vm2464_vm5, %v2459_v32, %v2466_v33 }
 0x2be   :  { %v2482_v57 = vmul.f32 %v2478_v52, %v2468_v36 }
 0x2c0   :  { %v2483_v58 = vadd.f32 %v2482_v57, %v2481_v56 }
 0x2c2   :  { %2484 = vadd.xlane.f32.xlu0 %v2483_v58 }
 0x34b   :  { %v2485_v60 = vpop.xlane.xlu0 %2484 }
 0x34c   :  { %v2493_v61 = vadd.f32 %v2827_v59, %v2485_v60 }
 0x34e   :  { %v2494_v62 = vsub.f32 0.0, %v2493_v61 }
 0x350   :  { %v2495_v63 = vmul.f32 1.442695, %v2494_v62 }
 0x352   :  { %3315 = vpow2.f32 %v2495_v63 }
 0x35f   :  { %v3316_v0 = vpop.eup %3315 }
 0x360   :  { %v2497_v1 = vadd.f32 1.0, %v3316_v0 }
 0x362   :  { %3317 = vrcp.f32 %v2497_v1 }
 0x36f   :  { %v3318_v29 = vpop.eup %3317 }
 0x370   :  { %2500 = vst.msk [vmem:[%s3527_s7] sm:$0xff] %vm2499_vm6, %v3318_v29 }
 0x371   :  { %2505 = vsyncpa [#allocation4], 1 }
 0x372   :  { %2506 = vsyncpa [#allocation6], 1 }

</bundles_post_ra>
